<compile_context>
chip_gen: v7x
topology: tpu7x:2x2x1
jax: 0.10.0
libtpu: 0.0.40
codegen_flags: <defaults>
</compile_context>

<pallas_src>
import math
from functools import partial

import jax
import jax.numpy as jnp
from jax import lax
from jax.experimental import pallas as pl
from jax.experimental.pallas import tpu as pltpu


# ------------------------------- tiling helper ------------------------------ #

def _pick_batch_tile(B, Lq):
    """Largest divisor Bt of B with Bt*Lq <= ~128 rows per step, preferring
    choices that keep the grid length >= 2 (v7x has two TensorCores)."""
    target = max(1, 128 // max(Lq, 1))
    divisors = [d for d in range(1, B + 1) if B % d == 0 and d <= target]
    if not divisors:
        return 1
    multi_step = [d for d in divisors if B // d >= 2]
    return max(multi_step) if multi_step else max(divisors)


# ----------------------------- fused MHA kernel ----------------------------- #

def _mha_kernel(*refs, num_heads, head_dim, compute_dtype, has_mask):
    """One grid step == Bt batch elements; all heads handled inside."""
    if has_mask:
        (q_ref, k_ref, v_ref, vl_ref,
         wq_ref, wk_ref, wv_ref, wo_ref, o_ref) = refs
    else:
        (q_ref, k_ref, v_ref,
         wq_ref, wk_ref, wv_ref, wo_ref, o_ref) = refs
        vl_ref = None

    H, d = num_heads, head_dim
    cd = compute_dtype
    Bt, Lq, Cq = q_ref.shape
    _, Lk, Ck = k_ref.shape
    Cv = v_ref.shape[-1]
    Do = o_ref.shape[-1]
    HD = H * d
    scale = jnp.float32(1.0 / math.sqrt(d))

    # ---- fused input projections: one wide MXU dot per tensor over the whole
    #      flattened (Bt*L, C) slab.  Weights arrive already in compute_dtype. --
    q2 = jnp.dot(q_ref[...].reshape(Bt * Lq, Cq).astype(cd), wq_ref[...],
                 preferred_element_type=jnp.float32)              # (Bt*Lq, H*d)
    k2 = jnp.dot(k_ref[...].reshape(Bt * Lk, Ck).astype(cd), wk_ref[...],
                 preferred_element_type=jnp.float32)              # (Bt*Lk, H*d)
    v2 = jnp.dot(v_ref[...].reshape(Bt * Lk, Cv).astype(cd), wv_ref[...],
                 preferred_element_type=jnp.float32)              # (Bt*Lk, H*d)
    q3 = q2.reshape(Bt, Lq, HD)
    k3 = k2.reshape(Bt, Lk, HD)
    v3 = v2.reshape(Bt, Lk, HD)

    keep = None
    if has_mask:
        # keep[b, q, c] = c < valid_len[b, q]; built once, shared by all heads.
        vl = vl_ref[...]                                          # (Bt, Lq, 1) i32
        col = lax.broadcasted_iota(jnp.int32, (Bt, Lq, Lk), 2)
        keep = col < vl

    wo = wo_ref[...]                                              # (H*d, Do)

    # ---- per-head attention; each head's PV result is accumulated straight
    #      through its sublane slice of W_o (no lane-axis concat). ------------
    acc = jnp.zeros((Bt * Lq, Do), jnp.float32)
    for h in range(H):
        sl = slice(h * d, (h + 1) * d)
        qh, kh, vh = q3[:, :, sl], k3[:, :, sl], v3[:, :, sl]

        # scores = qh @ kh^T / sqrt(d): contract on d directly, no K transpose.
        s = jnp.einsum("bqd,bkd->bqk", qh.astype(cd), kh.astype(cd),
                       preferred_element_type=jnp.float32) * scale
        if has_mask:
            s = jnp.where(keep, s, jnp.float32(-1000000.0))       # masked_softmax

        m = jnp.max(s, axis=-1, keepdims=True)                    # f32 softmax
        e = jnp.exp(s - m)
        denom = jnp.sum(e, axis=-1, keepdims=True)

        # Probabilities stay f32 for the PV contraction (f32 accumulate).
        pv = jnp.einsum("bqk,bkd->bqd", e, vh,
                        preferred_element_type=jnp.float32)       # (Bt, Lq, d)
        if cd == jnp.bfloat16:
            pv = pv * pl.reciprocal(denom, approx=True)           # EUP slot
        else:
            pv = pv / denom                                       # exact f32 path

        # d = head_dim is 8-aligned -> clean sublane slice of W_o.
        acc = acc + jnp.dot(pv.reshape(Bt * Lq, d).astype(cd), wo[sl, :],
                            preferred_element_type=jnp.float32)

    o_ref[...] = acc.reshape(Bt, Lq, Do).astype(o_ref.dtype)


@partial(jax.jit, static_argnames=("num_heads", "head_dim", "compute_dtype"))
def _mha_forward(queries, keys, values, vl3d, w_q, w_k, w_v, w_o, *,
                 num_heads, head_dim, compute_dtype):
    B, Lq, Cq = queries.shape
    _, Lk, Ck = keys.shape
    Cv = values.shape[-1]
    HD = num_heads * head_dim
    Do = w_o.shape[-1]
    has_mask = vl3d is not None

    Bt = _pick_batch_tile(B, Lq)
    grid = (B // Bt,)

    kernel = partial(_mha_kernel, num_heads=num_heads, head_dim=head_dim,
                     compute_dtype=compute_dtype, has_mask=has_mask)

    data_specs = [
        pl.BlockSpec((Bt, Lq, Cq), lambda b: (b, 0, 0)),          # queries
        pl.BlockSpec((Bt, Lk, Ck), lambda b: (b, 0, 0)),          # keys
        pl.BlockSpec((Bt, Lk, Cv), lambda b: (b, 0, 0)),          # values
    ]
    if has_mask:
        data_specs.append(pl.BlockSpec((Bt, Lq, 1), lambda b: (b, 0, 0)))

    weight_specs = [
        # Constant index_map -> weights stay VMEM-resident across the grid.
        # TODO(synk): pipeline_mode=pl.Buffered(1) would drop their double
        # buffer; irrelevant at these widths, revisit for v7x's 64 MiB VMEM.
        pl.BlockSpec((Cq, HD), lambda b: (0, 0)),
        pl.BlockSpec((Ck, HD), lambda b: (0, 0)),
        pl.BlockSpec((Cv, HD), lambda b: (0, 0)),
        pl.BlockSpec((HD, Do), lambda b: (0, 0)),
    ]

    args = [queries, keys, values]
    if has_mask:
        args.append(vl3d)
    args += [w_q, w_k, w_v, w_o]

    return pl.pallas_call(
        kernel,
        out_shape=jax.ShapeDtypeStruct((B, Lq, Do), jnp.float32),
        grid_spec=pltpu.PrefetchScalarGridSpec(
            num_scalar_prefetch=0,
            grid=grid,
            in_specs=data_specs + weight_specs,
            out_specs=pl.BlockSpec((Bt, Lq, Do), lambda b: (b, 0, 0)),
        ),
        compiler_params=pltpu.CompilerParams(
            # Batch-tile steps are fully independent -> shard across TCs on v7x.
            dimension_semantics=("parallel",)),
    )(*args)


# --------------------------- Module-level wrapper --------------------------- #

class MultiHeadAttentionPallas:
    """Pallas forward of MultiHeadAttention(key_size, query_size, value_size,
    num_hiddens, num_heads, dropout, bias=False).  As in the given PyTorch
    module, `num_hiddens` is the per-head width: projections are
    (in, num_hiddens*num_heads) and the output width is num_hiddens.
    compute_dtype=bfloat16 (default) uses bf16 MXU operands with f32
    accumulation and an f32 softmax; pass jnp.float32 for full-f32 numerics."""

    def __init__(self, key_size, query_size, value_size, num_hiddens,
                 num_heads, rng_key, compute_dtype=jnp.bfloat16):
        self.num_heads = num_heads
        self.num_hiddens = num_hiddens
        self.compute_dtype = compute_dtype
        k1, k2, k3, k4 = jax.random.split(rng_key, 4)

        def init(k, fan_in, fan_out):
            # PyTorch nn.Linear default init: U(-1/sqrt(fan_in), 1/sqrt(fan_in)),
            # stored as (in, out) so the forward pass is x @ W.
            bound = 1.0 / math.sqrt(fan_in)
            return jax.random.uniform(k, (fan_in, fan_out), jnp.float32,
                                      -bound, bound)

        # f32 masters (used by the pure-JAX reference) ...
        self.w_q = init(k1, query_size, num_hiddens * num_heads)
        self.w_k = init(k2, key_size, num_hiddens * num_heads)
        self.w_v = init(k3, value_size, num_hiddens * num_heads)
        self.w_o = init(k4, num_hiddens * num_heads, num_hiddens)
        # ... and compute_dtype copies handed to the kernel (pre-cast once, so
        # the bf16 path DMAs half the weight bytes and does no per-step casts).
        self.w_q_c = self.w_q.astype(compute_dtype)
        self.w_k_c = self.w_k.astype(compute_dtype)
        self.w_v_c = self.w_v.astype(compute_dtype)
        self.w_o_c = self.w_o.astype(compute_dtype)

    def __call__(self, queries, keys, values, valid_lens):
        # TODO(synk): dropout is identity in eval mode and is therefore omitted.
        B, Lq, _ = queries.shape
        # Normalise valid_lens (None / (B,) / (B, Lq)) to a (B, Lq, 1) int32
        # per-(batch, query) valid-key count — matches masked_softmax.  The
        # None case is a static specialization: no mask DMA / select at all.
        if valid_lens is None:
            vl3d = None
        elif valid_lens.ndim == 1:
            vl3d = jnp.broadcast_to(
                valid_lens.astype(jnp.int32)[:, None, None], (B, Lq, 1))
        else:
            vl3d = valid_lens.astype(jnp.int32)[:, :, None]

        return _mha_forward(queries, keys, values, vl3d,
                            self.w_q_c, self.w_k_c, self.w_v_c, self.w_o_c,
                            num_heads=self.num_heads,
                            head_dim=self.num_hiddens,
                            compute_dtype=self.compute_dtype)


# ------------------------------ pure-JAX ref -------------------------------- #

def reference(mha, queries, keys, values, valid_lens):
    B, Lq, _ = queries.shape
    Lk = keys.shape[1]
    H, d = mha.num_heads, mha.num_hiddens

    def split_heads(x):
        b, l, _ = x.shape
        return jnp.transpose(x.reshape(b, l, H, d),
                             (0, 2, 1, 3)).reshape(b * H, l, d)

    q = split_heads(queries @ mha.w_q)
    k = split_heads(keys @ mha.w_k)
    v = split_heads(values @ mha.w_v)
    scores = jnp.einsum("bqd,bkd->bqk", q, k) / math.sqrt(d)
    if valid_lens is not None:
        vl = jnp.repeat(valid_lens.astype(jnp.int32), H, axis=0)
        if vl.ndim == 1:
            mask = jnp.arange(Lk)[None, None, :] < vl[:, None, None]
        else:                                              # (B*H, Lq)
            mask = jnp.arange(Lk)[None, None, :] < vl[:, :, None]
        scores = jnp.where(mask, scores, -1000000.0)
    attn = jax.nn.softmax(scores, axis=-1)
    out = jnp.einsum("bqk,bkd->bqd", attn, v)
    out = jnp.transpose(out.reshape(B, H, Lq, d),
                        (0, 2, 1, 3)).reshape(B, Lq, H * d)
    return out @ mha.w_o


# ---------------------------------- main ------------------------------------ #

if __name__ == "__main__":
    key = jax.random.PRNGKey(0)
    kp, kq, kk, kv = jax.random.split(key, 4)

    # Small shapes: batch=8, seq=8, feature=16, num_hiddens(per-head)=32, heads=4.
    # B=8, Lq=8 -> Bt=4, grid=(2,): 32-row projection slabs and 2 parallel steps.
    B, Lq, Lk = 8, 8, 8
    query_size = key_size = value_size = 16
    num_hiddens, num_heads = 32, 4

    queries = jax.random.normal(kq, (B, Lq, query_size), jnp.float32)
    keys = jax.random.normal(kk, (B, Lk, key_size), jnp.float32)
    values = jax.random.normal(kv, (B, Lk, value_size), jnp.float32)
    valid_lens_1d = jnp.arange(1, B + 1, dtype=jnp.int32)               # (B,)
    valid_lens_2d = ((jnp.arange(B, dtype=jnp.int32)[:, None]
                      + jnp.arange(Lq, dtype=jnp.int32)[None, :]) % Lk + 1)

    # f32 compute — exact-divide softmax path.
    mha_f32 = MultiHeadAttentionPallas(key_size, query_size, value_size,
                                       num_hiddens, num_heads, kp,
                                       compute_dtype=jnp.float32)

    for vl in (valid_lens_1d, valid_lens_2d, None):
        out = jax.block_until_ready(mha_f32(queries, keys, values, vl))
        ref = reference(mha_f32, queries, keys, values, vl)
        assert out.shape == (B, Lq, num_hiddens), out.shape
        assert jnp.allclose(out, ref, atol=5e-3, rtol=5e-3), \
            float(jnp.max(jnp.abs(out - ref)))

    # bf16 MXU operands (default; v6e/v7x fast path), f32 softmax + accumulation.
    mha_bf16 = MultiHeadAttentionPallas(key_size, query_size, value_size,
                                        num_hiddens, num_heads, kp)
    out_bf = jax.block_until_ready(mha_bf16(queries, keys, values, valid_lens_1d))
    ref_bf = reference(mha_bf16, queries, keys, values, valid_lens_1d)
    assert jnp.allclose(out_bf, ref_bf, atol=5e-2, rtol=5e-2), \
        float(jnp.max(jnp.abs(out_bf - ref_bf)))

    print("KERNEL_OK")
</pallas_src>

<mosaic_0001>
module attributes {stable_mosaic.version = 11 : i64} {
  func.func @_mha_kernel(%arg0: i32, %arg1: memref<4x8x16xf32, #tpu.memory_space<vmem>>, %arg2: memref<4x8x16xf32, #tpu.memory_space<vmem>>, %arg3: memref<4x8x16xf32, #tpu.memory_space<vmem>>, %arg4: memref<4x8x1xi32, #tpu.memory_space<vmem>>, %arg5: memref<16x128xf32, #tpu.memory_space<vmem>>, %arg6: memref<16x128xf32, #tpu.memory_space<vmem>>, %arg7: memref<16x128xf32, #tpu.memory_space<vmem>>, %arg8: memref<128x32xf32, #tpu.memory_space<vmem>>, %arg9: memref<4x8x32xf32, #tpu.memory_space<vmem>>) attributes {dimension_semantics = [#tpu.dimension_semantics<parallel>], iteration_bounds = array<i64: 2>, scalar_prefetch = 0 : i64, scratch_operands = 0 : i64, tpu.core_type = #tpu.core_type<tc>, window_params = [{transform_indices = @transform_0, window_bounds = array<i64: 4, 8, 16>}, {transform_indices = @transform_1, window_bounds = array<i64: 4, 8, 16>}, {transform_indices = @transform_2, window_bounds = array<i64: 4, 8, 16>}, {transform_indices = @transform_3, window_bounds = array<i64: 4, 8, 1>}, {pipeline_mode = #tpu.pipeline_mode<synchronous>, transform_indices = @transform_4, window_bounds = array<i64: 16, 128>}, {pipeline_mode = #tpu.pipeline_mode<synchronous>, transform_indices = @transform_5, window_bounds = array<i64: 16, 128>}, {pipeline_mode = #tpu.pipeline_mode<synchronous>, transform_indices = @transform_6, window_bounds = array<i64: 16, 128>}, {pipeline_mode = #tpu.pipeline_mode<synchronous>, transform_indices = @transform_7, window_bounds = array<i64: 128, 32>}, {transform_indices = @transform_8, window_bounds = array<i64: 4, 8, 32>}]} {
    %c0 = arith.constant 0 : index
    %c0_0 = arith.constant 0 : index
    %c0_1 = arith.constant 0 : index
    %0 = vector.load %arg1[%c0, %c0_0, %c0_1] : memref<4x8x16xf32, #tpu.memory_space<vmem>>, vector<4x8x16xf32>
    %1 = vector.shape_cast %0 : vector<4x8x16xf32> to vector<32x16xf32>
    %c0_2 = arith.constant 0 : index
    %c0_3 = arith.constant 0 : index
    %2 = vector.load %arg5[%c0_2, %c0_3] : memref<16x128xf32, #tpu.memory_space<vmem>>, vector<16x128xf32>
    %cst = arith.constant dense<0.000000e+00> : vector<32x128xf32>
    %3 = tpu.matmul %1, %2, %cst {dimension_numbers = #tpu.dot_dimension_numbers<[1], [0], [0], [1], [0, 0, 1, 1], [], []>} : vector<32x16xf32>, vector<16x128xf32>, vector<32x128xf32> -> vector<32x128xf32>
    %c0_4 = arith.constant 0 : index
    %c0_5 = arith.constant 0 : index
    %c0_6 = arith.constant 0 : index
    %4 = vector.load %arg2[%c0_4, %c0_5, %c0_6] : memref<4x8x16xf32, #tpu.memory_space<vmem>>, vector<4x8x16xf32>
    %5 = vector.shape_cast %4 : vector<4x8x16xf32> to vector<32x16xf32>
    %c0_7 = arith.constant 0 : index
    %c0_8 = arith.constant 0 : index
    %6 = vector.load %arg6[%c0_7, %c0_8] : memref<16x128xf32, #tpu.memory_space<vmem>>, vector<16x128xf32>
    %cst_9 = arith.constant dense<0.000000e+00> : vector<32x128xf32>
    %7 = tpu.matmul %5, %6, %cst_9 {dimension_numbers = #tpu.dot_dimension_numbers<[1], [0], [0], [1], [0, 0, 1, 1], [], []>} : vector<32x16xf32>, vector<16x128xf32>, vector<32x128xf32> -> vector<32x128xf32>
    %c0_10 = arith.constant 0 : index
    %c0_11 = arith.constant 0 : index
    %c0_12 = arith.constant 0 : index
    %8 = vector.load %arg3[%c0_10, %c0_11, %c0_12] : memref<4x8x16xf32, #tpu.memory_space<vmem>>, vector<4x8x16xf32>
    %9 = vector.shape_cast %8 : vector<4x8x16xf32> to vector<32x16xf32>
    %c0_13 = arith.constant 0 : index
    %c0_14 = arith.constant 0 : index
    %10 = vector.load %arg7[%c0_13, %c0_14] : memref<16x128xf32, #tpu.memory_space<vmem>>, vector<16x128xf32>
    %cst_15 = arith.constant dense<0.000000e+00> : vector<32x128xf32>
    %11 = tpu.matmul %9, %10, %cst_15 {dimension_numbers = #tpu.dot_dimension_numbers<[1], [0], [0], [1], [0, 0, 1, 1], [], []>} : vector<32x16xf32>, vector<16x128xf32>, vector<32x128xf32> -> vector<32x128xf32>
    %12 = vector.shape_cast %3 : vector<32x128xf32> to vector<4x8x128xf32>
    %13 = vector.shape_cast %7 : vector<32x128xf32> to vector<4x8x128xf32>
    %14 = vector.shape_cast %11 : vector<32x128xf32> to vector<4x8x128xf32>
    %c0_16 = arith.constant 0 : index
    %c0_17 = arith.constant 0 : index
    %c0_18 = arith.constant 0 : index
    %15 = vector.load %arg4[%c0_16, %c0_17, %c0_18] : memref<4x8x1xi32, #tpu.memory_space<vmem>>, vector<4x8x1xi32>
    %16 = tpu.iota {dimensions = array<i32: 2>} : vector<4x8x8xi32>
    %17 = vector.broadcast %15 : vector<4x8x1xi32> to vector<4x8x8xi32>
    %18 = arith.cmpi slt, %16, %17 : vector<4x8x8xi32>
    %c0_19 = arith.constant 0 : index
    %c0_20 = arith.constant 0 : index
    %19 = vector.load %arg8[%c0_19, %c0_20] : memref<128x32xf32, #tpu.memory_space<vmem>>, vector<128x32xf32>
    %cst_21 = arith.constant 0.000000e+00 : f32
    %20 = vector.broadcast %cst_21 : f32 to vector<32x32xf32>
    %21 = vector.extract_strided_slice %12 {offsets = [0, 0, 0], sizes = [4, 8, 32], strides = [1, 1, 1]} : vector<4x8x128xf32> to vector<4x8x32xf32>
    %22 = vector.extract_strided_slice %13 {offsets = [0, 0, 0], sizes = [4, 8, 32], strides = [1, 1, 1]} : vector<4x8x128xf32> to vector<4x8x32xf32>
    %23 = vector.extract_strided_slice %14 {offsets = [0, 0, 0], sizes = [4, 8, 32], strides = [1, 1, 1]} : vector<4x8x128xf32> to vector<4x8x32xf32>
    "tpu.trace_start"() <{level = 10 : i32, message = "bqd,bkd->bqk"}> : () -> ()
    %cst_22 = arith.constant dense<0.000000e+00> : vector<4x8x8xf32>
    %24 = tpu.matmul %21, %22, %cst_22 {dimension_numbers = #tpu.dot_dimension_numbers<[2], [2], [1], [1], [0, 0, 0, 1, 1, 1], [0], [0]>} : vector<4x8x32xf32>, vector<4x8x32xf32>, vector<4x8x8xf32> -> vector<4x8x8xf32>
    "tpu.trace_stop"() : () -> ()
    %cst_23 = arith.constant 0.176776692 : f32
    %25 = vector.broadcast %cst_23 : f32 to vector<4x8x8xf32>
    %26 = arith.mulf %24, %25 : vector<4x8x8xf32>
    %cst_24 = arith.constant -1.000000e+06 : f32
    %27 = vector.broadcast %cst_24 : f32 to vector<4x8x8xf32>
    %28 = arith.select %18, %26, %27 : vector<4x8x8xi1>, vector<4x8x8xf32>
    %cst_25 = arith.constant dense<0xFF800000> : vector<4x8xf32>
    %29 = vector.multi_reduction <maximumf>, %28, %cst_25 [2] : vector<4x8x8xf32> to vector<4x8xf32>
    %30 = vector.shape_cast %29 : vector<4x8xf32> to vector<4x8x1xf32>
    %31 = vector.broadcast %30 : vector<4x8x1xf32> to vector<4x8x8xf32>
    %32 = arith.subf %28, %31 : vector<4x8x8xf32>
    %33 = math.exp %32 : vector<4x8x8xf32>
    %cst_26 = arith.constant dense<0.000000e+00> : vector<4x8xf32>
    %34 = vector.multi_reduction <add>, %33, %cst_26 [2] : vector<4x8x8xf32> to vector<4x8xf32>
    %35 = vector.shape_cast %34 : vector<4x8xf32> to vector<4x8x1xf32>
    "tpu.trace_start"() <{level = 10 : i32, message = "bqk,bkd->bqd"}> : () -> ()
    %cst_27 = arith.constant dense<0.000000e+00> : vector<4x8x32xf32>
    %36 = tpu.matmul %33, %23, %cst_27 {dimension_numbers = #tpu.dot_dimension_numbers<[2], [1], [1], [2], [0, 0, 0, 1, 1, 2], [0], [0]>} : vector<4x8x8xf32>, vector<4x8x32xf32>, vector<4x8x32xf32> -> vector<4x8x32xf32>
    "tpu.trace_stop"() : () -> ()
    %37 = vector.broadcast %35 : vector<4x8x1xf32> to vector<4x8x32xf32>
    %38 = arith.divf %36, %37 : vector<4x8x32xf32>
    %39 = vector.shape_cast %38 : vector<4x8x32xf32> to vector<32x32xf32>
    %40 = vector.extract_strided_slice %19 {offsets = [0, 0], sizes = [32, 32], strides = [1, 1]} : vector<128x32xf32> to vector<32x32xf32>
    %cst_28 = arith.constant dense<0.000000e+00> : vector<32x32xf32>
    %41 = tpu.matmul %39, %40, %cst_28 {dimension_numbers = #tpu.dot_dimension_numbers<[1], [0], [0], [1], [0, 0, 1, 1], [], []>} : vector<32x32xf32>, vector<32x32xf32>, vector<32x32xf32> -> vector<32x32xf32>
    %42 = arith.addf %20, %41 : vector<32x32xf32>
    %43 = vector.extract_strided_slice %12 {offsets = [0, 0, 32], sizes = [4, 8, 32], strides = [1, 1, 1]} : vector<4x8x128xf32> to vector<4x8x32xf32>
    %44 = vector.extract_strided_slice %13 {offsets = [0, 0, 32], sizes = [4, 8, 32], strides = [1, 1, 1]} : vector<4x8x128xf32> to vector<4x8x32xf32>
    %45 = vector.extract_strided_slice %14 {offsets = [0, 0, 32], sizes = [4, 8, 32], strides = [1, 1, 1]} : vector<4x8x128xf32> to vector<4x8x32xf32>
    "tpu.trace_start"() <{level = 10 : i32, message = "bqd,bkd->bqk"}> : () -> ()
    %cst_29 = arith.constant dense<0.000000e+00> : vector<4x8x8xf32>
    %46 = tpu.matmul %43, %44, %cst_29 {dimension_numbers = #tpu.dot_dimension_numbers<[2], [2], [1], [1], [0, 0, 0, 1, 1, 1], [0], [0]>} : vector<4x8x32xf32>, vector<4x8x32xf32>, vector<4x8x8xf32> -> vector<4x8x8xf32>
    "tpu.trace_stop"() : () -> ()
    %cst_30 = arith.constant 0.176776692 : f32
    %47 = vector.broadcast %cst_30 : f32 to vector<4x8x8xf32>
    %48 = arith.mulf %46, %47 : vector<4x8x8xf32>
    %cst_31 = arith.constant -1.000000e+06 : f32
    %49 = vector.broadcast %cst_31 : f32 to vector<4x8x8xf32>
    %50 = arith.select %18, %48, %49 : vector<4x8x8xi1>, vector<4x8x8xf32>
    %cst_32 = arith.constant dense<0xFF800000> : vector<4x8xf32>
    %51 = vector.multi_reduction <maximumf>, %50, %cst_32 [2] : vector<4x8x8xf32> to vector<4x8xf32>
    %52 = vector.shape_cast %51 : vector<4x8xf32> to vector<4x8x1xf32>
    %53 = vector.broadcast %52 : vector<4x8x1xf32> to vector<4x8x8xf32>
    %54 = arith.subf %50, %53 : vector<4x8x8xf32>
    %55 = math.exp %54 : vector<4x8x8xf32>
    %cst_33 = arith.constant dense<0.000000e+00> : vector<4x8xf32>
    %56 = vector.multi_reduction <add>, %55, %cst_33 [2] : vector<4x8x8xf32> to vector<4x8xf32>
    %57 = vector.shape_cast %56 : vector<4x8xf32> to vector<4x8x1xf32>
    "tpu.trace_start"() <{level = 10 : i32, message = "bqk,bkd->bqd"}> : () -> ()
    %cst_34 = arith.constant dense<0.000000e+00> : vector<4x8x32xf32>
    %58 = tpu.matmul %55, %45, %cst_34 {dimension_numbers = #tpu.dot_dimension_numbers<[2], [1], [1], [2], [0, 0, 0, 1, 1, 2], [0], [0]>} : vector<4x8x8xf32>, vector<4x8x32xf32>, vector<4x8x32xf32> -> vector<4x8x32xf32>
    "tpu.trace_stop"() : () -> ()
    %59 = vector.broadcast %57 : vector<4x8x1xf32> to vector<4x8x32xf32>
    %60 = arith.divf %58, %59 : vector<4x8x32xf32>
    %61 = vector.shape_cast %60 : vector<4x8x32xf32> to vector<32x32xf32>
    %62 = vector.extract_strided_slice %19 {offsets = [32, 0], sizes = [32, 32], strides = [1, 1]} : vector<128x32xf32> to vector<32x32xf32>
    %cst_35 = arith.constant dense<0.000000e+00> : vector<32x32xf32>
    %63 = tpu.matmul %61, %62, %cst_35 {dimension_numbers = #tpu.dot_dimension_numbers<[1], [0], [0], [1], [0, 0, 1, 1], [], []>} : vector<32x32xf32>, vector<32x32xf32>, vector<32x32xf32> -> vector<32x32xf32>
    %64 = arith.addf %42, %63 : vector<32x32xf32>
    %65 = vector.extract_strided_slice %12 {offsets = [0, 0, 64], sizes = [4, 8, 32], strides = [1, 1, 1]} : vector<4x8x128xf32> to vector<4x8x32xf32>
    %66 = vector.extract_strided_slice %13 {offsets = [0, 0, 64], sizes = [4, 8, 32], strides = [1, 1, 1]} : vector<4x8x128xf32> to vector<4x8x32xf32>
    %67 = vector.extract_strided_slice %14 {offsets = [0, 0, 64], sizes = [4, 8, 32], strides = [1, 1, 1]} : vector<4x8x128xf32> to vector<4x8x32xf32>
    "tpu.trace_start"() <{level = 10 : i32, message = "bqd,bkd->bqk"}> : () -> ()
    %cst_36 = arith.constant dense<0.000000e+00> : vector<4x8x8xf32>
    %68 = tpu.matmul %65, %66, %cst_36 {dimension_numbers = #tpu.dot_dimension_numbers<[2], [2], [1], [1], [0, 0, 0, 1, 1, 1], [0], [0]>} : vector<4x8x32xf32>, vector<4x8x32xf32>, vector<4x8x8xf32> -> vector<4x8x8xf32>
    "tpu.trace_stop"() : () -> ()
    %cst_37 = arith.constant 0.176776692 : f32
    %69 = vector.broadcast %cst_37 : f32 to vector<4x8x8xf32>
    %70 = arith.mulf %68, %69 : vector<4x8x8xf32>
    %cst_38 = arith.constant -1.000000e+06 : f32
    %71 = vector.broadcast %cst_38 : f32 to vector<4x8x8xf32>
    %72 = arith.select %18, %70, %71 : vector<4x8x8xi1>, vector<4x8x8xf32>
    %cst_39 = arith.constant dense<0xFF800000> : vector<4x8xf32>
    %73 = vector.multi_reduction <maximumf>, %72, %cst_39 [2] : vector<4x8x8xf32> to vector<4x8xf32>
    %74 = vector.shape_cast %73 : vector<4x8xf32> to vector<4x8x1xf32>
    %75 = vector.broadcast %74 : vector<4x8x1xf32> to vector<4x8x8xf32>
    %76 = arith.subf %72, %75 : vector<4x8x8xf32>
    %77 = math.exp %76 : vector<4x8x8xf32>
    %cst_40 = arith.constant dense<0.000000e+00> : vector<4x8xf32>
    %78 = vector.multi_reduction <add>, %77, %cst_40 [2] : vector<4x8x8xf32> to vector<4x8xf32>
    %79 = vector.shape_cast %78 : vector<4x8xf32> to vector<4x8x1xf32>
    "tpu.trace_start"() <{level = 10 : i32, message = "bqk,bkd->bqd"}> : () -> ()
    %cst_41 = arith.constant dense<0.000000e+00> : vector<4x8x32xf32>
    %80 = tpu.matmul %77, %67, %cst_41 {dimension_numbers = #tpu.dot_dimension_numbers<[2], [1], [1], [2], [0, 0, 0, 1, 1, 2], [0], [0]>} : vector<4x8x8xf32>, vector<4x8x32xf32>, vector<4x8x32xf32> -> vector<4x8x32xf32>
    "tpu.trace_stop"() : () -> ()
    %81 = vector.broadcast %79 : vector<4x8x1xf32> to vector<4x8x32xf32>
    %82 = arith.divf %80, %81 : vector<4x8x32xf32>
    %83 = vector.shape_cast %82 : vector<4x8x32xf32> to vector<32x32xf32>
    %84 = vector.extract_strided_slice %19 {offsets = [64, 0], sizes = [32, 32], strides = [1, 1]} : vector<128x32xf32> to vector<32x32xf32>
    %cst_42 = arith.constant dense<0.000000e+00> : vector<32x32xf32>
    %85 = tpu.matmul %83, %84, %cst_42 {dimension_numbers = #tpu.dot_dimension_numbers<[1], [0], [0], [1], [0, 0, 1, 1], [], []>} : vector<32x32xf32>, vector<32x32xf32>, vector<32x32xf32> -> vector<32x32xf32>
    %86 = arith.addf %64, %85 : vector<32x32xf32>
    %87 = vector.extract_strided_slice %12 {offsets = [0, 0, 96], sizes = [4, 8, 32], strides = [1, 1, 1]} : vector<4x8x128xf32> to vector<4x8x32xf32>
    %88 = vector.extract_strided_slice %13 {offsets = [0, 0, 96], sizes = [4, 8, 32], strides = [1, 1, 1]} : vector<4x8x128xf32> to vector<4x8x32xf32>
    %89 = vector.extract_strided_slice %14 {offsets = [0, 0, 96], sizes = [4, 8, 32], strides = [1, 1, 1]} : vector<4x8x128xf32> to vector<4x8x32xf32>
    "tpu.trace_start"() <{level = 10 : i32, message = "bqd,bkd->bqk"}> : () -> ()
    %cst_43 = arith.constant dense<0.000000e+00> : vector<4x8x8xf32>
    %90 = tpu.matmul %87, %88, %cst_43 {dimension_numbers = #tpu.dot_dimension_numbers<[2], [2], [1], [1], [0, 0, 0, 1, 1, 1], [0], [0]>} : vector<4x8x32xf32>, vector<4x8x32xf32>, vector<4x8x8xf32> -> vector<4x8x8xf32>
    "tpu.trace_stop"() : () -> ()
    %cst_44 = arith.constant 0.176776692 : f32
    %91 = vector.broadcast %cst_44 : f32 to vector<4x8x8xf32>
    %92 = arith.mulf %90, %91 : vector<4x8x8xf32>
    %cst_45 = arith.constant -1.000000e+06 : f32
    %93 = vector.broadcast %cst_45 : f32 to vector<4x8x8xf32>
    %94 = arith.select %18, %92, %93 : vector<4x8x8xi1>, vector<4x8x8xf32>
    %cst_46 = arith.constant dense<0xFF800000> : vector<4x8xf32>
    %95 = vector.multi_reduction <maximumf>, %94, %cst_46 [2] : vector<4x8x8xf32> to vector<4x8xf32>
    %96 = vector.shape_cast %95 : vector<4x8xf32> to vector<4x8x1xf32>
    %97 = vector.broadcast %96 : vector<4x8x1xf32> to vector<4x8x8xf32>
    %98 = arith.subf %94, %97 : vector<4x8x8xf32>
    %99 = math.exp %98 : vector<4x8x8xf32>
    %cst_47 = arith.constant dense<0.000000e+00> : vector<4x8xf32>
    %100 = vector.multi_reduction <add>, %99, %cst_47 [2] : vector<4x8x8xf32> to vector<4x8xf32>
    %101 = vector.shape_cast %100 : vector<4x8xf32> to vector<4x8x1xf32>
    "tpu.trace_start"() <{level = 10 : i32, message = "bqk,bkd->bqd"}> : () -> ()
    %cst_48 = arith.constant dense<0.000000e+00> : vector<4x8x32xf32>
    %102 = tpu.matmul %99, %89, %cst_48 {dimension_numbers = #tpu.dot_dimension_numbers<[2], [1], [1], [2], [0, 0, 0, 1, 1, 2], [0], [0]>} : vector<4x8x8xf32>, vector<4x8x32xf32>, vector<4x8x32xf32> -> vector<4x8x32xf32>
    "tpu.trace_stop"() : () -> ()
    %103 = vector.broadcast %101 : vector<4x8x1xf32> to vector<4x8x32xf32>
    %104 = arith.divf %102, %103 : vector<4x8x32xf32>
    %105 = vector.shape_cast %104 : vector<4x8x32xf32> to vector<32x32xf32>
    %106 = vector.extract_strided_slice %19 {offsets = [96, 0], sizes = [32, 32], strides = [1, 1]} : vector<128x32xf32> to vector<32x32xf32>
    %cst_49 = arith.constant dense<0.000000e+00> : vector<32x32xf32>
    %107 = tpu.matmul %105, %106, %cst_49 {dimension_numbers = #tpu.dot_dimension_numbers<[1], [0], [0], [1], [0, 0, 1, 1], [], []>} : vector<32x32xf32>, vector<32x32xf32>, vector<32x32xf32> -> vector<32x32xf32>
    %108 = arith.addf %86, %107 : vector<32x32xf32>
    %109 = vector.shape_cast %108 : vector<32x32xf32> to vector<4x8x32xf32>
    %c0_50 = arith.constant 0 : index
    %c0_51 = arith.constant 0 : index
    %c0_52 = arith.constant 0 : index
    %110 = vector.load %arg9[%c0_50, %c0_51, %c0_52] : memref<4x8x32xf32, #tpu.memory_space<vmem>>, vector<4x8x32xf32>
    tpu.vector_store %arg9[%c0_50, %c0_51, %c0_52], %109 {strides = array<i32>} : memref<4x8x32xf32, #tpu.memory_space<vmem>>, vector<4x8x32xf32>,
    return
  }
  func.func @transform_0(%arg0: i32) -> (i32, i32, i32) {
    %c0_i32 = arith.constant 0 : i32
    %c0_i32_0 = arith.constant 0 : i32
    %c0_i32_1 = arith.constant 0 : i32
    return %arg0, %c0_i32, %c0_i32_0 : i32, i32, i32
  }
  func.func @transform_1(%arg0: i32) -> (i32, i32, i32) {
    %c0_i32 = arith.constant 0 : i32
    %c0_i32_0 = arith.constant 0 : i32
    %c0_i32_1 = arith.constant 0 : i32
    return %arg0, %c0_i32, %c0_i32_0 : i32, i32, i32
  }
  func.func @transform_2(%arg0: i32) -> (i32, i32, i32) {
    %c0_i32 = arith.constant 0 : i32
    %c0_i32_0 = arith.constant 0 : i32
    %c0_i32_1 = arith.constant 0 : i32
    return %arg0, %c0_i32, %c0_i32_0 : i32, i32, i32
  }
  func.func @transform_3(%arg0: i32) -> (i32, i32, i32) {
    %c0_i32 = arith.constant 0 : i32
    %c0_i32_0 = arith.constant 0 : i32
    %c0_i32_1 = arith.constant 0 : i32
    return %arg0, %c0_i32, %c0_i32_0 : i32, i32, i32
  }
  func.func @transform_4(%arg0: i32) -> (i32, i32) {
    %c0_i32 = arith.constant 0 : i32
    %c0_i32_0 = arith.constant 0 : i32
    %c0_i32_1 = arith.constant 0 : i32
    return %c0_i32, %c0_i32_0 : i32, i32
  }
  func.func @transform_5(%arg0: i32) -> (i32, i32) {
    %c0_i32 = arith.constant 0 : i32
    %c0_i32_0 = arith.constant 0 : i32
    %c0_i32_1 = arith.constant 0 : i32
    return %c0_i32, %c0_i32_0 : i32, i32
  }
  func.func @transform_6(%arg0: i32) -> (i32, i32) {
    %c0_i32 = arith.constant 0 : i32
    %c0_i32_0 = arith.constant 0 : i32
    %c0_i32_1 = arith.constant 0 : i32
    return %c0_i32, %c0_i32_0 : i32, i32
  }
  func.func @transform_7(%arg0: i32) -> (i32, i32) {
    %c0_i32 = arith.constant 0 : i32
    %c0_i32_0 = arith.constant 0 : i32
    %c0_i32_1 = arith.constant 0 : i32
    return %c0_i32, %c0_i32_0 : i32, i32
  }
  func.func @transform_8(%arg0: i32) -> (i32, i32, i32) {
    %c0_i32 = arith.constant 0 : i32
    %c0_i32_0 = arith.constant 0 : i32
    %c0_i32_1 = arith.constant 0 : i32
    return %arg0, %c0_i32, %c0_i32_0 : i32, i32, i32
  }
}

</mosaic_0001>

<bundles_post_ra>
// kernel: _mha_forward.1
= control target key start
LH: loop header
LB: loop body
LE: loop exit
PB: predicated region body
PF: predicated region fallthrough
CT: control target
= control target key end

     0   :  { %13 = vsyncpa [#allocation3], 0  ;;  %s5482_s0 = inlined_call_operand.vmem [shape: f32[8,8,16], index: 0, kind: input, shape index: {}]   ;;  %s5483_s1 = inlined_call_operand.vmem [shape: f32[8,8,16], index: 1, kind: input, shape index: {}]   ;;  %s5484_s2 = inlined_call_operand.vmem [shape: f32[8,8,16], index: 2, kind: input, shape index: {}]   ;;  %s5485_s3 = inlined_call_operand.vmem [shape: s32[8,8,1], index: 3, kind: input, shape index: {}]   ;;  %s5486_s4 = inlined_call_operand.vmem [shape: f32[16,128], index: 4, kind: input, shape index: {}]   ;;  %s5487_s5 = inlined_call_operand.hbm [shape: f32[16,128], index: 5, kind: input, shape index: {}]   ;;  %s5488_s6 = inlined_call_operand.hbm [shape: f32[16,128], index: 6, kind: input, shape index: {}]   ;;  %s5489_s7 = inlined_call_operand.vmem [shape: f32[128,32], index: 7, kind: input, shape index: {}]   ;;  %s5490_s8 = inlined_call_operand.hbm [shape: f32[8,8,32], index: 8, kind: output, shape index: {}]  }
   0x1   :  { %14 = vsyncpa [#allocation6], 0 }
   0x2   :  { %15 = vsyncpa [#allocation4], 0 }
   0x3   :  { %17 = vsyncpa [#allocation4 + $0x1], 0  ;;  %s4779_s27 = smov 0   ;;  %s4781_s28 = smov 0  }
   0x4   :  { %s4783_s29 = smov 0   ;;  %s4785_s30 = smov 0  }
   0x5 LB: > { %5495 = sst [smem:[#allocation11_spill]] %s4715_s29  ;;  %s4800_s9 = sadd.s32 4294967295, %s4719_s30   ;;  %s4719_s30 = sphi %s4785_s30, %s5512_s30   ;;  %s4715_s29 = sphi %s4783_s29, %s5509_s29   ;;  %s4711_s28 = sphi %s4781_s28, %s5511_s28   ;;  %s4707_s27 = sphi %s4779_s27, %s5510_s27  }
   0x6   : > { %s3943_s10 = sadd.s32 4294967294, %s4719_s30   ;;  %s4804_s11 = sadd.s32 1, %s4719_s30  }
   0x7   : > { %s218_s12 = sadd.s32 1, %s4715_s29  ;;  %s215_s13 = ssub.s32 %s4719_s30, %s4804_s11 }
   0x8   : > { %p228_p0 = scmp.ne.s32.totalorder %s4715_s29, %s4711_s28  ;;  %p216_p1 = scmp.eq.s32.totalorder %s215_s13, 0 }
   0x9   : > { %p229_p2 = scmp.eq.s32.totalorder %s4800_s9, 1  ;;  %p234_p3 = scmp.ne.s32.totalorder %s4711_s28, %s4707_s27 }
   0xa   : > { %p235_p4 = scmp.eq.s32.totalorder %s3943_s10, 1  ;;  %p3944_p7 = scmp.ge.s32.totalorder %s4719_s30, 1 }
   0xb   : > { %s4815_s14 = scalar_select %p216_p1, %s4715_s29, %s218_s12  }
   0xc   : > { %p4817_p5 = por %p229_p2, %p228_p0  ;;  %p4821_p6 = por %p235_p4, %p234_p3 }
   0xd   : > { %5496 = sst [smem:[#allocation12_spill]] %s4815_s14  ;;  %p242_p8 = scmp.lt.s32.totalorder %s4719_s30, 3 }
   0xe   : > { %s5497_s15 = scalar_select %p4817_p5, 1, 0 }
   0xf   : > { %s5498_s16 = scalar_select %p4821_p6, 1, 0 }
  0x10   : > { %p5491_p9 = scmp.eq.s32.totalorder %s4800_s9, 0  ;;  %p4828_p10 = pnand %p3944_p7, %p242_p8 }
  0x11   : > { %s4721_s18 = smov [#allocation2]   ;;  %s4722_s21 = smov [#allocation5]  }
  0x12   : > { %s5499_s17 = scalar_select %p4828_p10, 1, 0 }
  0x13   : > { %s257_s19 = sshll.u32 %s4721_s18, 4  ;;  %p4468_p11 = pneg %p4828_p10  ;;  %s258_s19 = int_to_ptr.vmem [resolvable:$true] %s257_s19 }
  0x14   : > { %s270_s22 = sshll.u32 %s4722_s21, 4  ;;  %s4593_s25 = scalar_lea.hbm %s5487_s5, 256  ;;  %s4840_s22 = int_to_ptr.vmem [resolvable:$true] %s270_s22 }
  0x15   : > { %p4836_p12 = pnand %p5491_p9, %p4468_p11  ;;  %p4594_p13 = scmp.ne.s32.totalorder %s5487_s5, %s4593_s25 }
  0x16   : > { %p4600_p3 = scmp.lt.u32.totalorder %s4593_s25, %s5487_s5 }
  0x17   : > { %p4595_p0 = pneg %p4836_p12 }
  0x19   : > { %p4596_p1 = pnand %p4595_p0, %p4594_p13 }
  0x1b   : > { %p4597_p2 = pneg %p4596_p1 }
  0x1d   : > { %p4602_p4 = pnand %p4600_p3, %p4597_p2 }
  0x1f   : > { %4605 = shalt.err (!%p4602_p4)
}
  0x20   : > { %s4606_s18 = scalar_lea.vmem %s258_s19, 256  ;;  %p4614_p9 = scmp.lt.s32.totalorder %s258_s19, %s258_s19 }
  0x21   : > { %p4607_p7 = scmp.ne.s32.totalorder %s258_s19, %s4606_s18  ;;  %p4615_p6 = scmp.lt.s32.totalorder %s4606_s18, %s4606_s18 }
  0x23   : > { %p4609_p8 = pnand %p4607_p7, %p4595_p0  ;;  %p4616_p5 = por %p4615_p6, %p4614_p9 }
  0x25   : > { %p4610_p11 = pneg %p4609_p8 }
  0x27   : > { %p4617_p10 = pnand %p4616_p5, %p4610_p11 }
  0x29   : > { %4620 = shalt.err (!%p4617_p10)
}
  0x2a   : > { %s4723_s21 = smov 128   ;;  %s4724_s23 = smov 8  }
  0x2b   : > { %4471 = dma.hbm_to_vmem [thread:$0]  (!%p4836_p12), %s5487_s5, 256, %s258_s19, [#allocation3], %s4723_s21, %s4723_s21, %s4724_s23  }
  0x2c   : > { %s4621_s12 = scalar_lea.hbm %s5488_s6, 256 }
  0x2d   : > { %p4622_p13 = scmp.ne.s32.totalorder %s5488_s6, %s4621_s12  ;;  %p4628_p9 = scmp.lt.u32.totalorder %s4621_s12, %s5488_s6 }
  0x2f   : > { %p4624_p5 = pnand %p4622_p13, %p4595_p0 }
  0x31   : > { %p4625_p6 = pneg %p4624_p5 }
  0x33   : > { %p4630_p10 = pnand %p4628_p9, %p4625_p6 }
  0x35   : > { %4633 = shalt.err (!%p4630_p10)
}
  0x36   : > { %s4634_s19 = scalar_lea.vmem %s4840_s22, 256  ;;  %p4642_p4 = scmp.lt.s32.totalorder %s4840_s22, %s4840_s22 }
  0x37   : > { %p4635_p1 = scmp.ne.s32.totalorder %s4840_s22, %s4634_s19  ;;  %p4643_p7 = scmp.lt.s32.totalorder %s4634_s19, %s4634_s19 }
  0x39   : > { %p4637_p2 = pnand %p4635_p1, %p4595_p0  ;;  %p4644_p8 = por %p4643_p7, %p4642_p4 }
  0x3b   : > { %p4638_p3 = pneg %p4637_p2 }
  0x3d   : > { %p4645_p11 = pnand %p4644_p8, %p4638_p3 }
  0x3f   : > { %4648 = shalt.err (!%p4645_p11)
}
  0x40   : > { %4474 = dma.hbm_to_vmem [thread:$0]  (!%p4836_p12), %s5488_s6, 256, %s4840_s22, [#allocation6], %s4723_s21, %s4723_s21, %s4724_s23  }
  0x41   : > { %p5501_p13 = scmp.ne.s32.totalorder %s5499_s17, 0 }
  0x42   : > { %p5502_p5 = scmp.eq.s32.totalorder (!%p5501_p13), %s4800_s9, 0 }
  0x43   : > { %325 = sbr.rel (%p5501_p13) target bundleno = 2295 (0x8f7), region = 52 }
  0x4a   : > { %4694 = dma.done.wait (%p5502_p5), [#allocation3], 256   ;;  %p5503_p0 = pmov %p5502_p5 }
  0x4c   : > { %4696 = vsyncadd (%p5503_p0), [#allocation3], 4294967040  ;;  %p5504_p6 = pmov %p5503_p0 }
  0x4d   : > { %p5505_p9 = pmov %p5503_p0 }
  0x4e   : > { %4698 = dma.done.wait (%p5504_p6), [#allocation6], 256  }
  0x4f   : > { %4700 = vsyncadd (%p5505_p9), [#allocation6], 4294967040  ;;  %s3952_s20 = sshll.u32 %s4800_s9, 2  ;;  %v4725_v0 = vmov 0   ;;  %vm409_vm0 = vcmask 130048   ;;  %v407_v1 = vld [vmem:[%s5486_s4] sm:$0xff]  ;;  %v717_v45 = vlaneseq }
  0x50   : > { %p379_p10 = scmp.lt.s32.totalorder %s3952_s20, 7  ;;  %4528 = vset.pattern.permute.xlu0 %v4725_v0  ;;  %v408_v2 = vld [vmem:[%s5486_s4 + $0x8] sm:$0xff]  ;;  %v511_v5 = vld [vmem:[#allocation2] sm:$0xff]  ;;  %v614_v17 = vld [vmem:[#allocation5] sm:$0xff]  ;;  %v4726_v22 = vmov 0.0   ;;  %vm4727_vm1 = vmmov 0  }
  0x51   : > { %v4402_v4 = vpack.c.bf16 %v408_v2, %v407_v1  ;;  %v512_v6 = vld [vmem:[#allocation2 + $0x8] sm:$0xff]  ;;  %v615_v18 = vld [vmem:[#allocation5 + $0x8] sm:$0xff]  ;;  %vm751_vm2 = vcmask 261120   ;;  %v5016_v48 = vand.u32 127, %v717_v45  ;;  %vm1064_vm5 = vcmask 64512   ;;  %s4730_s24 = smov 32  }
  0x52   : > { %s5514_s20 = smov (!%p379_p10, %s3952_s20), 7  ;;  %v4406_v7 = vpack.c.bf16 %v512_v6, %v511_v5  ;;  %v4410_v19 = vpack.c.bf16 %v615_v18, %v614_v17  ;;  %s375_s12 = sand.u32 1, %s4711_s28  }
  0x53   : > { %s4900_s17 = sshll.u32 %s5514_s20, 3  ;;  %4403 = vmatprep.subr.bf16.mxu1 %v4402_v4  ;;  %s3951_s13 = sshll.u32 %s375_s12, 5 }
  0x54   : > { %s382_s23 = scalar_lea.vmem %s5482_s0, %s4900_s17  ;;  %s4917_s18 = scalar_lea.vmem %s5485_s3, %s4900_s17  ;;  %4405 = vmatpush3.bf16.msra.mxu1 %v4402_v4  ;;  %4411 = vmatprep.subr.bf16.mxu0 %v4410_v19 }
  0x55   : > { %v403_v3 = vld [vmem:[%s382_s23] sm:$0xff]  ;;  %v404_v8 = vld [vmem:[%s382_s23 + $0x8] sm:$0xff]  ;;  %v405_v10 = vld [vmem:[%s382_s23 + $0x10] sm:$0xff]  ;;  %4407 = vmatprep.subr.bf16.mxu1 %v4406_v7  ;;  %s388_s14 = scalar_lea.vmem %s5483_s1, %s4900_s17  ;;  %4413 = vmatpush3.bf16.msra.mxu0 %v4410_v19  ;;  %s394_s21 = scalar_lea.vmem %s5484_s2, %s4900_s17 }
  0x56   : > { %4160 = vmatprep.mubr.msk.f32.mxu1 %vm409_vm0, %v403_v3  ;;  %v714_v9 = vld [vmem:[%s4917_s18 + $0x8] sm:$0xff]  ;;  %v716_v11 = vld [vmem:[%s4917_s18 + $0x18] sm:$0xff]  ;;  %v507_v13 = vld [vmem:[%s388_s14] sm:$0xff]  ;;  %4196 = vmatprep.subr.mxu0 %v4726_v22  ;;  %s4728_s17 = smov 96   ;;  %s4041_s29 = sshll.u32 %s4800_s9, 9 }
  0x57   : > { %723 = vperm.xlu0 %4528, %v714_v9   ;;  %4161 = vmatmul.mubr.msk.f32.vlgmr.msra.gmra.mrb[0].mxu1 %vm409_vm0, %v404_v8  ;;  %v406_v12 = vld [vmem:[%s382_s23 + $0x18] sm:$0xff]  ;;  %v508_v14 = vld [vmem:[%s388_s14 + $0x8] sm:$0xff]  ;;  %v509_v15 = vld [vmem:[%s388_s14 + $0x10] sm:$0xff]  ;;  %s4729_s23 = smov 64   ;;  %s5441_s22 = scalar_lea.sflag [#allocation4], %s375_s12 }
  0x58   : > { %4163 = vmatprep.mubr.msk.f32.mxu1 %vm409_vm0, %v405_v10  ;;  %4409 = vmatpush3.bf16.msra.mxu1 %v4406_v7  ;;  %v510_v16 = vld [vmem:[%s388_s14 + $0x18] sm:$0xff]  ;;  %v610_v20 = vld [vmem:[%s394_s21] sm:$0xff]  ;;  %v611_v21 = vld [vmem:[%s394_s21 + $0x8] sm:$0xff]  ;;  %p5506_p1 = scmp.ne.s32.totalorder %s5497_s15, 0  ;;  %s4731_s9 = smov [#allocation7]  }
  0x59   : > { %4180 = vmatprep.mubr.msk.f32.mxu0 %vm409_vm0, %v610_v20  ;;  %4186 = vmatprep.subr.mxu1 %v4726_v22  ;;  %v612_v23 = vld [vmem:[%s394_s21 + $0x10] sm:$0xff]  ;;  %v613_v24 = vld [vmem:[%s394_s21 + $0x18] sm:$0xff]  ;;  %v713_v33 = vld [vmem:[%s4917_s18] sm:$0xff] }
  0x5a   : > { %4181 = vmatmul.mubr.msk.f32.vlgmr.msra.gmra.mrb[0].mxu0 %vm409_vm0, %v611_v21  ;;  %v715_v34 = vld [vmem:[%s4917_s18 + $0x10] sm:$0xff]  ;;  %s377_s18 = scalar_lea.vmem [#allocation7], %s3951_s13 }
  0x5b   : > { %729 = vperm.xlu0 %4528, %v716_v11   ;;  %4164 = vmatmul.mubr.msk.f32.gmra.mrb[2].mxu1 %vm409_vm0, %v406_v12  ;;  %s3823_s19 = sshll.u32 %s377_s18, 4  ;;  %s5432_s19 = int_to_ptr.vmem [resolvable:$true] %s3823_s19 }
  0x5c   : > { %4170 = vmatprep.mubr.msk.f32.mxu1 %vm409_vm0, %v507_v13  ;;  %4183 = vmatprep.mubr.msk.f32.mxu0 %vm409_vm0, %v612_v23  ;;  %s4649_s21 = scalar_lea.vmem %s5432_s19, 512 }
  0x5d   : > { %p4650_p12 = scmp.ne.s32.totalorder %s5432_s19, %s4649_s21 }
  0x5e   : > { %4184 = vmatmul.mubr.msk.f32.gmra.mrb[2].mxu0 %vm409_vm0, %v613_v24 }
  0x5f   : > { %4171 = vmatmul.mubr.msk.f32.vlgmr.msra.gmra.mrb[4].mxu1 %vm409_vm0, %v508_v14  ;;  %4198 = vmatprep.mubr.msk.f32.mxu0 %vm4727_vm1, %v4726_v22  ;;  %p4651_p2 = pnand %p4650_p12, %p5506_p1 }
  0x60   : > { %4173 = vmatprep.mubr.msk.f32.mxu1 %vm409_vm0, %v509_v15 }
  0x61   : > { %p4652_p3 = pneg %p4651_p2 }
  0x63   : > { %4174 = vmatmul.mubr.msk.f32.gmra.mrb[6].mxu1 %vm409_vm0, %v510_v16 }
  0x64   : > { %4188 = vmatprep.mubr.msk.f32.mxu1 %vm4727_vm1, %v4726_v22 }
  0xd6   : > { %v5010_v39 = vpop.permute.xlu0 %723 }
  0xd7   : > { %vm732_vm3 = vcmp.lt.s32.totalorder %v5016_v48, %v5010_v39 }
  0xda   : > { %v5012_v40 = vpop.permute.xlu0 %729 }
  0xdb   : > { %vm734_vm6 = vcmp.lt.s32.totalorder %v5016_v48, %v5012_v40 }
 0x12a   : > { %v4946_v25 = vpop.f32.mrb[0].mxu1 }
 0x12b   : > { %v4948_v26 = vpop.f32.mrb[1].mxu1 }
 0x12d   : > { %v4998_v35 = vpop.f32.mrb[0].mxu0 }
 0x12e   : > { %v4950_v27 = vpop.f32.mrb[2].mxu1  ;;  %v5002_v36 = vpop.f32.mrb[1].mxu0 }
 0x12f   : > { %v4952_v28 = vpop.f32.mrb[3].mxu1 }
 0x131   : > { %v5004_v37 = vpop.f32.mrb[2].mxu0 }
 0x132   : > { %v4954_v29 = vpop.f32.mrb[4].mxu1  ;;  %v5007_v38 = vpop.f32.mrb[3].mxu0 }
 0x133   : > { %1481 = vrot.lane.b32.xlu0 %v4954_v29, %s4728_s17  ;;  %v4958_v30 = vpop.f32.mrb[5].mxu1 }
 0x134   : > { %4187 = vmatpush3.xpose.msk.msra.mxu1 %vm751_vm2, %v4958_v30 }
 0x135   : > { %4191 = vmatprep.subr.mxu1 %v4726_v22 }
 0x136   : > { %v4963_v31 = vpop.f32.mrb[6].mxu1 }
 0x137   : > { %4189 = vmatmul.mubr.msk.f32.vlgmr.msra.gmra.mrb[8].mxu1 %vm751_vm2, %v4948_v26  ;;  %1637 = vrot.lane.b32.xlu0 %v4963_v31, %s4728_s17  ;;  %v4969_v32 = vpop.f32.mrb[7].mxu1 }
 0x138   : > { %4192 = vmatpush3.xpose.msk.msra.mxu1 %vm751_vm2, %v4954_v29  ;;  %4197 = vmatpush3.xpose.msk.msra.mxu0 %vm751_vm2, %v4969_v32 }
 0x139   : > { %4193 = vmatprep.mubr.msk.f32.mxu1 %vm4727_vm1, %v4726_v22  ;;  %4201 = vmatprep.subr.mxu1 %v4726_v22 }
 0x13a   : > { %4206 = vmatprep.subr.mxu0 %v4726_v22 }
 0x13b   : > { %4194 = vmatmul.mubr.msk.f32.vlgmr.msra.gmra.mrb[10].mxu1 %vm751_vm2, %v4946_v25  ;;  %1635 = vrot.lane.b32.xlu0 %v4950_v27, %s4728_s17 }
 0x13c   : > { %4199 = vmatmul.mubr.msk.f32.vlgmr.msra.gmra.mrb[4].mxu0 %vm751_vm2, %v4952_v28  ;;  %4202 = vmatpush3.xpose.msk.msra.mxu1 %vm751_vm2, %v4963_v31 }
 0x13d   : > { %4203 = vmatprep.mubr.msk.f32.mxu1 %vm4727_vm1, %v4726_v22  ;;  %4211 = vmatprep.subr.mxu1 %v4726_v22 }
 0x13e   : > { %4208 = vmatprep.mubr.msk.f32.mxu0 %vm4727_vm1, %v4726_v22  ;;  %4207 = vmatpush3.msra.mxu0 %v5002_v36 }
 0x13f   : > { %4204 = vmatmul.mubr.msk.f32.vlgmr.msra.gmra.mrb[12].mxu1 %vm751_vm2, %v4950_v27  ;;  %720 = vperm.xlu0 %4528, %v713_v33  }
 0x140   : > { %4213 = vmatprep.mubr.msk.f32.mxu1 %vm4727_vm1, %v4726_v22  ;;  %4212 = vmatpush3.msra.mxu1 %v4998_v35 }
 0x141   : > { %4221 = vmatprep.subr.mxu1 %v4726_v22  ;;  %4216 = vmatprep.subr.mxu0 %v4726_v22 }
 0x143   : > { %726 = vperm.xlu0 %4528, %v715_v34  }
 0x1a5   : > { %v1482_v41 = vpop.permute.xlu0 %1481 }
 0x1a9   : > { %v1638_v42 = vpop.permute.xlu0 %1637 }
 0x1ad   : > { %v1636_v43 = vpop.permute.xlu0 %1635 }
 0x1be   : > { %v5014_v44 = vpop.permute.xlu0 %720 }
 0x1bf   : > { %vm731_vm7 = vcmp.lt.s32.totalorder %v5016_v48, %v5014_v44 }
 0x1c2   : > { %v5018_v49 = vpop.permute.xlu0 %726 }
 0x1c3   : > { %vm733_vm4 = vcmp.lt.s32.totalorder %v5016_v48, %v5018_v49 }
 0x20a   : > { %v824_v46 = vpop.f32.mrb[8].mxu1 }
 0x20b   : > { %v4190_v47 = vpop.f32.mrb[9].mxu1  ;;  %v1056_v1 = vmul.f32 0.17677669, %v824_v46 }
 0x20d   : > { %v1060_v2 = vsel %vm731_vm7, %v1056_v1, -1000000.0 }
 0x20e   : > { %v900_v50 = vpop.f32.mrb[10].mxu1  ;;  %v1065_v3 = vsel %vm1064_vm5, %v1060_v2, -inf }
 0x20f   : > { %v1057_v51 = vmul.f32 0.17677669, %v900_v50  ;;  %v976_v52 = vpop.f32.mrb[4].mxu0  ;;  %v4195_v53 = vpop.f32.mrb[11].mxu1 }
 0x210   : > { %v1058_v54 = vmul.f32 0.17677669, %v976_v52  ;;  %v4200_v55 = vpop.f32.mrb[5].mxu0 }
 0x211   : > { %v1061_v56 = vsel %vm732_vm3, %v1057_v51, -1000000.0 }
 0x212   : > { %v1052_v57 = vpop.f32.mrb[12].mxu1  ;;  %v1062_v58 = vsel %vm733_vm4, %v1058_v54, -1000000.0  ;;  %v1068_v59 = vsel %vm1064_vm5, %v1061_v56, -inf }
 0x213   : > { %v1059_v60 = vmul.f32 0.17677669, %v1052_v57  ;;  %v1071_v61 = vsel %vm1064_vm5, %v1062_v58, -inf  ;;  %1069 = vmax.xlane.f32.xlu1 %v1068_v59  ;;  %v4205_v62 = vpop.f32.mrb[13].mxu1 }
 0x214   : > { %1072 = vmax.xlane.f32.xlu0 %v1071_v61 }
 0x215   : > { %v1063_v63 = vsel %vm734_vm6, %v1059_v60, -1000000.0 }
 0x216   : > { %v1074_v0 = vsel %vm1064_vm5, %v1063_v63, -inf }
 0x217   : > { %1075 = vmax.xlane.f32.xlu1 %v1074_v0 }
 0x228   : > { %1479 = vrot.lane.b32.xlu1 %v4946_v25, %s4728_s17 }
 0x22a   : > { %1403 = vrot.lane.b32.xlu0 %v4958_v30, %s4728_s17 }
 0x22e   : > { %1557 = vrot.lane.b32.xlu0 %v4952_v28, %s4728_s17 }
 0x24c   : > { %1066 = vmax.xlane.f32.xlu1 %v1065_v3 }
 0x25d   : > { %1401 = vrot.lane.b32.xlu1 %v4948_v26, %s4728_s17 }
 0x261   : > { %1559 = vrot.lane.b32.xlu1 %v4969_v32, %s4728_s17 }
 0x2a0   : > { %v1070_v4 = vpop.xlane.xlu1 %1069 }
 0x2a1   : > { %v1078_v5 = vsub.f32 %v1061_v56, %v1070_v4  ;;  %v1073_v13 = vpop.xlane.xlu0 %1072 }
 0x2a2   : > { %v1079_v15 = vsub.f32 %v1062_v58, %v1073_v13 }
 0x2a3   : > { %v1083_v6 = vmul.f32 1.442695, %v1078_v5 }
 0x2a4   : > { %v1076_v7 = vpop.xlane.xlu1 %1075  ;;  %v1085_v18 = vmul.f32 1.442695, %v1079_v15 }
 0x2a5   : > { %4529 = vpow2.f32 %v1083_v6  ;;  %v1080_v8 = vsub.f32 %v1063_v63, %v1076_v7  ;;  %v1404_v23 = vpop.permute.xlu0 %1403 }
 0x2a7   : > { %v1087_v9 = vmul.f32 1.442695, %v1080_v8 }
 0x2a8   : > { %v1480_v12 = vpop.permute.xlu1 %1479 }
 0x2a9   : > { %4531 = vpow2.f32 %v1087_v9  ;;  %v1558_v33 = vpop.permute.xlu0 %1557 }
 0x2af   : > { %v5054_v10 = vpop.eup %4529 }
 0x2b0   : > { %4214 = vmatmul.mubr.msk.f32.vlgmr.msra.gmra.mrb[14].mxu1 %vm1064_vm5, %v5054_v10 }
 0x2b1   : > { %4222 = vmatpush3.msra.mxu1 %v5004_v37  ;;  %4223 = vmatprep.mubr.msk.f32.mxu1 %vm4727_vm1, %v4726_v22 }
 0x2b2   : > { %4231 = vmatprep.subr.mxu1 %v4726_v22 }
 0x2b3   : > { %v5062_v11 = vpop.eup %4531 }
 0x2b4   : > { %4224 = vmatmul.mubr.msk.f32.vlgmr.msra.gmra.mrb[16].mxu1 %vm1064_vm5, %v5062_v11 }
 0x2b5   : > { %4233 = vmatprep.mubr.msk.f32.mxu1 %vm4727_vm1, %v4726_v22 }
 0x2b8   : > { %4232 = vmatpush3.xpose.msk.msra.mxu1 %vm751_vm2, %v1482_v41 }
 0x2b9   : > { %4241 = vmatprep.subr.mxu1 %v4726_v22 }
 0x2bb   : > { %4234 = vmatmul.mubr.msk.f32.vlgmr.msra.gmra.mrb[18].mxu1 %vm751_vm2, %v1480_v12 }
 0x2bc   : > { %4242 = vmatpush3.xpose.msk.msra.mxu1 %vm751_vm2, %v1638_v42  ;;  %4243 = vmatprep.mubr.msk.f32.mxu1 %vm4727_vm1, %v4726_v22 }
 0x2bd   : > { %4251 = vmatprep.subr.mxu1 %v4726_v22 }
 0x2bf   : > { %4244 = vmatmul.mubr.msk.f32.vlgmr.msra.gmra.mrb[20].mxu1 %vm751_vm2, %v1636_v43 }
 0x2c0   : > { %4253 = vmatprep.mubr.msk.f32.mxu1 %vm4727_vm1, %v4726_v22 }
 0x2d9   : > { %v1067_v14 = vpop.xlane.xlu1 %1066 }
 0x2da   : > { %v1077_v16 = vsub.f32 %v1060_v2, %v1067_v14 }
 0x2dc   : > { %v1081_v17 = vmul.f32 1.442695, %v1077_v16 }
 0x2dd   : > { %v1402_v21 = vpop.permute.xlu1 %1401 }
 0x2de   : > { %4533 = vpow2.f32 %v1081_v17 }
 0x2df   : > { %4535 = vpow2.f32 %v1085_v18 }
 0x2e1   : > { %v1560_v24 = vpop.permute.xlu1 %1559 }
 0x2e8   : > { %v5078_v19 = vpop.eup %4533 }
 0x2e9   : > { %4209 = vmatmul.mubr.msk.f32.vlgmr.msra.gmra.mrb[6].mxu0 %vm1064_vm5, %v5078_v19  ;;  %v5086_v20 = vpop.eup %4535 }
 0x2ea   : > { %4217 = vmatpush3.msra.mxu0 %v5007_v38  ;;  %4218 = vmatprep.mubr.msk.f32.mxu0 %vm4727_vm1, %v4726_v22 }
 0x2eb   : > { %4226 = vmatprep.subr.mxu0 %v4726_v22 }
 0x2ed   : > { %4219 = vmatmul.mubr.msk.f32.vlgmr.msra.gmra.mrb[8].mxu0 %vm1064_vm5, %v5086_v20 }
 0x2ee   : > { %4228 = vmatprep.mubr.msk.f32.mxu0 %vm4727_vm1, %v4726_v22 }
 0x2f1   : > { %4227 = vmatpush3.xpose.msk.msra.mxu0 %vm751_vm2, %v1404_v23 }
 0x2f2   : > { %4236 = vmatprep.subr.mxu0 %v4726_v22 }
 0x2f4   : > { %4229 = vmatmul.mubr.msk.f32.vlgmr.msra.gmra.mrb[10].mxu0 %vm751_vm2, %v1402_v21 }
 0x2f5   : > { %4237 = vmatpush3.xpose.msk.msra.mxu0 %vm751_vm2, %v1560_v24  ;;  %4238 = vmatprep.mubr.msk.f32.mxu0 %vm4727_vm1, %v4726_v22 }
 0x2f6   : > { %4246 = vmatprep.subr.mxu0 %v4726_v22 }
 0x2f8   : > { %4239 = vmatmul.mubr.msk.f32.vlgmr.msra.gmra.mrb[12].mxu0 %vm751_vm2, %v1558_v33 }
 0x2f9   : > { %4248 = vmatprep.mubr.msk.f32.mxu0 %vm4727_vm1, %v4726_v22 }
 0x383   : > { %v5102_v34 = vpop.f32.mrb[14].mxu1 }
 0x384   : > { %v4215_v41 = vpop.f32.mrb[15].mxu1 }
 0x387   : > { %v5104_v42 = vpop.f32.mrb[16].mxu1 }
 0x388   : > { %v4225_v43 = vpop.f32.mrb[17].mxu1 }
 0x38e   : > { %v1553_v45 = vpop.f32.mrb[18].mxu1 }
 0x38f   : > { %v1714_v46 = vmul.f32 0.17677669, %v1553_v45  ;;  %v4235_v47 = vpop.f32.mrb[19].mxu1 }
 0x391   : > { %v1718_v50 = vsel %vm732_vm3, %v1714_v46, -1000000.0 }
 0x392   : > { %v1709_v51 = vpop.f32.mrb[20].mxu1  ;;  %v1724_v52 = vsel %vm1064_vm5, %v1718_v50, -inf }
 0x393   : > { %v1716_v53 = vmul.f32 0.17677669, %v1709_v51  ;;  %1725 = vmax.xlane.f32.xlu1 %v1724_v52  ;;  %v4245_v54 = vpop.f32.mrb[21].mxu1 }
 0x395   : > { %v1720_v55 = vsel %vm734_vm6, %v1716_v53, -1000000.0 }
 0x396   : > { %v1730_v56 = vsel %vm1064_vm5, %v1720_v55, -inf }
 0x397   : > { %1731 = vmax.xlane.f32.xlu0 %v1730_v56 }
 0x3a4   : > { %1989 = vrot.lane.b32.xlu1 %v5004_v37, %s4728_s17 }
 0x3a8   : > { %2269 = vrot.lane.b32.xlu1 %v4958_v30, %s4729_s23 }
 0x3ac   : > { %2347 = vrot.lane.b32.xlu1 %v4954_v29, %s4729_s23 }
 0x3ad   : > { %1835 = vrot.lane.b32.xlu0 %v4998_v35, %s4728_s17 }
 0x3b0   : > { %2425 = vrot.lane.b32.xlu1 %v4969_v32, %s4729_s23 }
 0x3b1   : > { %2267 = vrot.lane.b32.xlu0 %v4948_v26, %s4729_s23 }
 0x3b4   : > { %2503 = vrot.lane.b32.xlu1 %v4963_v31, %s4729_s23 }
 0x3b5   : > { %2345 = vrot.lane.b32.xlu0 %v4946_v25, %s4729_s23 }
 0x3b9   : > { %2423 = vrot.lane.b32.xlu0 %v4952_v28, %s4729_s23 }
 0x3bc   : > { %v5132_v57 = vpop.f32.mrb[6].mxu0 }
 0x3bd   : > { %2501 = vrot.lane.b32.xlu0 %v4950_v27, %s4729_s23  ;;  %v4210_v58 = vpop.f32.mrb[7].mxu0 }
 0x3c0   : > { %v5136_v59 = vpop.f32.mrb[8].mxu0 }
 0x3c1   : > { %v4220_v60 = vpop.f32.mrb[9].mxu0 }
 0x3c7   : > { %v1475_v61 = vpop.f32.mrb[10].mxu0 }
 0x3c8   : > { %v4230_v62 = vpop.f32.mrb[11].mxu0  ;;  %v1713_v1 = vmul.f32 0.17677669, %v1475_v61 }
 0x3ca   : > { %v1717_v3 = vsel %vm731_vm7, %v1713_v1, -1000000.0 }
 0x3cb   : > { %v1631_v63 = vpop.f32.mrb[12].mxu0  ;;  %v1721_v4 = vsel %vm1064_vm5, %v1717_v3, -inf }
 0x3cc   : > { %v4240_v0 = vpop.f32.mrb[13].mxu0  ;;  %v1715_v2 = vmul.f32 0.17677669, %v1631_v63 }
 0x3ce   : > { %v1719_v5 = vsel %vm733_vm4, %v1715_v2, -1000000.0 }
 0x3cf   : > { %v1727_v6 = vsel %vm1064_vm5, %v1719_v5, -inf }
 0x3d8   : > { %1722 = vmax.xlane.f32.xlu1 %v1721_v4 }
 0x3dc   : > { %1728 = vmax.xlane.f32.xlu0 %v1727_v6 }
 0x3e9   : > { %1912 = vrot.lane.b32.xlu1 %v5007_v38, %s4728_s17 }
 0x3f2   : > { %1758 = vrot.lane.b32.xlu0 %v5002_v36, %s4728_s17  ;;  %s4653_s17 = sshll.u32 %s4731_s9, 4  ;;  %s4654_s17 = int_to_ptr.vmem [resolvable:$false] %s4653_s17 }
 0x3f3   : > { %p4656_p4 = scmp.lt.s32.totalorder %s5432_s19, %s4654_s17 }
 0x420   : > { %v1726_v7 = vpop.xlane.xlu1 %1725 }
 0x421   : > { %v1734_v8 = vsub.f32 %v1718_v50, %v1726_v7 }
 0x423   : > { %v1739_v9 = vmul.f32 1.442695, %v1734_v8 }
 0x424   : > { %v1732_v12 = vpop.xlane.xlu0 %1731  ;;  %v1990_v16 = vpop.permute.xlu1 %1989 }
 0x425   : > { %4537 = vpow2.f32 %v1739_v9  ;;  %v1736_v13 = vsub.f32 %v1720_v55, %v1732_v12 }
 0x427   : > { %v1743_v14 = vmul.f32 1.442695, %v1736_v13 }
 0x428   : > { %v1836_v15 = vpop.permute.xlu0 %1835  ;;  %v2270_v18 = vpop.permute.xlu1 %2269 }
 0x429   : > { %4539 = vpow2.f32 %v1743_v14  ;;  %4252 = vmatpush3.msra.mxu1 %v1836_v15 }
 0x42a   : > { %4261 = vmatprep.subr.mxu1 %v4726_v22 }
 0x42c   : > { %v2268_v23 = vpop.permute.xlu0 %2267  ;;  %v2348_v24 = vpop.permute.xlu1 %2347 }
 0x42f   : > { %v5151_v17 = vpop.eup %4537 }
 0x430   : > { %4254 = vmatmul.mubr.msk.f32.vlgmr.msra.gmra.mrb[22].mxu1 %vm1064_vm5, %v5151_v17  ;;  %v2346_v33 = vpop.permute.xlu0 %2345  ;;  %v2426_v41 = vpop.permute.xlu1 %2425 }
 0x431   : > { %4262 = vmatpush3.msra.mxu1 %v1990_v16  ;;  %4263 = vmatprep.mubr.msk.f32.mxu1 %vm4727_vm1, %v4726_v22 }
 0x432   : > { %4294 = vmatprep.subr.mxu1 %v4726_v22 }
 0x433   : > { %v5158_v21 = vpop.eup %4539 }
 0x434   : > { %4264 = vmatmul.mubr.msk.f32.vlgmr.msra.gmra.mrb[24].mxu1 %vm1064_vm5, %v5158_v21  ;;  %v2424_v43 = vpop.permute.xlu0 %2423  ;;  %v2504_v45 = vpop.permute.xlu1 %2503 }
 0x435   : > { %4296 = vmatprep.mubr.msk.f32.mxu1 %vm4727_vm1, %v4726_v22 }
 0x438   : > { %4295 = vmatpush3.xpose.msk.msra.mxu1 %vm751_vm2, %v2270_v18  ;;  %v2502_v46 = vpop.permute.xlu0 %2501 }
 0x439   : > { %4299 = vmatprep.subr.mxu1 %v4726_v22 }
 0x43b   : > { %4297 = vmatmul.mubr.msk.f32.vlgmr.msra.gmra.mrb[26].mxu1 %vm751_vm2, %v2268_v23  ;;  %v1098_v23 = vsel %vm1064_vm5, %v5062_v11, 0.0  ;;  %v1095_v11 = vsel %vm1064_vm5, %v5086_v20, 0.0  ;;  %v741_v20 = vld [vmem:[%s5489_s7 + $0x30] sm:$0xff] }
 0x43c   : > { %4300 = vmatpush3.xpose.msk.msra.mxu1 %vm751_vm2, %v2348_v24  ;;  %4301 = vmatprep.mubr.msk.f32.mxu1 %vm4727_vm1, %v4726_v22 }
 0x43d   : > { %4304 = vmatprep.subr.mxu1 %v4726_v22 }
 0x43f   : > { %4302 = vmatmul.mubr.msk.f32.vlgmr.msra.gmra.mrb[28].mxu1 %vm751_vm2, %v2346_v33 }
 0x440   : > { %4305 = vmatpush3.xpose.msk.msra.mxu1 %vm751_vm2, %v2426_v41  ;;  %4306 = vmatprep.mubr.msk.f32.mxu1 %vm4727_vm1, %v4726_v22 }
 0x441   : > { %4309 = vmatprep.subr.mxu1 %v4726_v22 }
 0x443   : > { %4307 = vmatmul.mubr.msk.f32.vlgmr.msra.gmra.mrb[30].mxu1 %vm751_vm2, %v2424_v43 }
 0x444   : > { %4310 = vmatpush3.xpose.msk.msra.mxu1 %vm751_vm2, %v2504_v45  ;;  %4311 = vmatprep.mubr.msk.f32.mxu1 %vm4727_vm1, %v4726_v22  ;;  %v740_v45 = vld [vmem:[%s5489_s7 + $0x28] sm:$0xff] }
 0x445   : > { %4314 = vmatprep.subr.mxu1 %v4726_v22 }
 0x447   : > { %4312 = vmatmul.mubr.msk.f32.vlgmr.msra.gmra.mrb[32].mxu1 %vm751_vm2, %v2502_v46 }
 0x448   : > { %4316 = vmatprep.mubr.msk.f32.mxu1 %vm4727_vm1, %v4726_v22 }
 0x465   : > { %v1723_v47 = vpop.xlane.xlu1 %1722 }
 0x466   : > { %v1733_v50 = vsub.f32 %v1717_v3, %v1723_v47  ;;  %v742_v47 = vld [vmem:[%s5489_s7 + $0x38] sm:$0xff] }
 0x468   : > { %v1737_v51 = vmul.f32 1.442695, %v1733_v50  ;;  %v4418_v50 = vpack.c.bf16 %v742_v47, %v741_v20 }
 0x469   : > { %v1729_v52 = vpop.xlane.xlu0 %1728  ;;  %v1913_v58 = vpop.permute.xlu1 %1912 }
 0x46a   : > { %4541 = vpow2.f32 %v1737_v51  ;;  %v1735_v53 = vsub.f32 %v1719_v5, %v1729_v52  ;;  %v735_v51 = vld [vmem:[%s5489_s7] sm:$0xff]  ;;  %v736_v52 = vld [vmem:[%s5489_s7 + $0x8] sm:$0xff] }
 0x46c   : > { %v1741_v54 = vmul.f32 1.442695, %v1735_v53  ;;  %v5279_v53 = vpack.c.bf16 %v736_v52, %v735_v51 }
 0x46d   : > { %v1759_v55 = vpop.permute.xlu0 %1758 }
 0x46e   : > { %4543 = vpow2.f32 %v1741_v54  ;;  %4247 = vmatpush3.msra.mxu0 %v1759_v55 }
 0x46f   : > { %4256 = vmatprep.subr.mxu0 %v4726_v22 }
 0x474   : > { %v4542_v56 = vpop.eup %4541 }
 0x475   : > { %4249 = vmatmul.mubr.msk.f32.vlgmr.msra.gmra.mrb[14].mxu0 %vm1064_vm5, %v4542_v56 }
 0x476   : > { %4257 = vmatpush3.msra.mxu0 %v1913_v58  ;;  %4258 = vmatprep.mubr.msk.f32.mxu0 %vm4727_vm1, %v4726_v22 }
 0x478   : > { %v4544_v60 = vpop.eup %4543 }
 0x479   : > { %4259 = vmatmul.mubr.msk.f32.vlgmr.msra.gmra.mrb[16].mxu0 %vm1064_vm5, %v4544_v60  ;;  %v1751_v24 = vsel %vm1064_vm5, %v4544_v60, 0.0 }
 0x503   : > { %v5189_v61 = vpop.f32.mrb[22].mxu1 }
 0x504   : > { %v4255_v62 = vpop.f32.mrb[23].mxu1 }
 0x507   : > { %v5191_v63 = vpop.f32.mrb[24].mxu1 }
 0x508   : > { %v4265_v0 = vpop.f32.mrb[25].mxu1 }
 0x50e   : > { %v2341_v1 = vpop.f32.mrb[26].mxu1 }
 0x50f   : > { %v2579_v2 = vmul.f32 0.17677669, %v2341_v1  ;;  %v4298_v3 = vpop.f32.mrb[27].mxu1 }
 0x511   : > { %v5196_v4 = vsel %vm731_vm7, %v2579_v2, -1000000.0 }
 0x512   : > { %v2419_v5 = vpop.f32.mrb[28].mxu1  ;;  %v2587_v6 = vsel %vm1064_vm5, %v5196_v4, -inf }
 0x513   : > { %2588 = vmax.xlane.f32.xlu1 %v2587_v6  ;;  %v4303_v7 = vpop.f32.mrb[29].mxu1  ;;  %v2580_v33 = vmul.f32 0.17677669, %v2419_v5 }
 0x515   : > { %v5255_v41 = vsel %vm732_vm3, %v2580_v33, -1000000.0 }
 0x516   : > { %v2497_v8 = vpop.f32.mrb[30].mxu1  ;;  %v2590_v43 = vsel %vm1064_vm5, %v5255_v41, -inf }
 0x517   : > { %v2581_v9 = vmul.f32 0.17677669, %v2497_v8  ;;  %v4308_v12 = vpop.f32.mrb[31].mxu1 }
 0x519   : > { %v5203_v13 = vsel %vm733_vm4, %v2581_v9, -1000000.0 }
 0x51a   : > { %v2575_v14 = vpop.f32.mrb[32].mxu1  ;;  %v2593_v15 = vsel %vm1064_vm5, %v5203_v13, -inf }
 0x51b   : > { %2594 = vmax.xlane.f32.xlu0 %v2593_v15  ;;  %v4313_v16 = vpop.f32.mrb[33].mxu1 }
 0x524   : > { %2775 = vrot.lane.b32.xlu1 %v5007_v38, %s4729_s23 }
 0x528   : > { %3038 = vrot.lane.b32.xlu1 %v4958_v30, %s4730_s24 }
 0x52c   : > { %3116 = vrot.lane.b32.xlu1 %v4954_v29, %s4730_s24 }
 0x530   : > { %3194 = vrot.lane.b32.xlu1 %v4969_v32, %s4730_s24 }
 0x531   : > { %2623 = vrot.lane.b32.xlu0 %v5002_v36, %s4729_s23 }
 0x534   : > { %3272 = vrot.lane.b32.xlu1 %v4963_v31, %s4730_s24  ;;  %v1745_v31 = vsel %vm1064_vm5, %v4542_v56, 0.0 }
 0x535   : > { %3036 = vrot.lane.b32.xlu0 %v4948_v26, %s4730_s24  ;;  %v1754_v26 = vsel %vm1064_vm5, %v5158_v21, 0.0 }
 0x539   : > { %3114 = vrot.lane.b32.xlu0 %v4946_v25, %s4730_s24  ;;  %v1092_v25 = vsel %vm1064_vm5, %v5054_v10, 0.0  ;;  %v1089_v10 = vsel %vm1064_vm5, %v5078_v19, 0.0  ;;  %v739_v19 = vld [vmem:[%s5489_s7 + $0x20] sm:$0xff] }
 0x53a   : > { %v4414_v46 = vpack.c.bf16 %v740_v45, %v739_v19 }
 0x53c   : > { %4415 = vmatprep.subr.bf16.mxu0 %v4414_v46 }
 0x53d   : > { %3192 = vrot.lane.b32.xlu0 %v4952_v28, %s4730_s24  ;;  %v1748_v28 = vsel %vm1064_vm5, %v5151_v17, 0.0  ;;  %4417 = vmatpush3.bf16.msra.mxu0 %v4414_v46 }
 0x53e   : > { %4419 = vmatprep.subr.bf16.mxu0 %v4418_v50 }
 0x541   : > { %3270 = vrot.lane.b32.xlu0 %v4950_v27, %s4730_s24  ;;  %v2582_v27 = vmul.f32 0.17677669, %v2575_v14  ;;  %4421 = vmatpush3.bf16.msra.mxu0 %v4418_v50 }
 0x542   : > { %4423 = vmatprep.subr.bf16.mxu0 %v5279_v53 }
 0x543   : > { %v5244_v21 = vsel %vm734_vm6, %v2582_v27, -1000000.0 }
 0x544   : > { %v2596_v17 = vsel %vm1064_vm5, %v5244_v21, -inf }
 0x548   : > { %v5227_v29 = vpop.f32.mrb[14].mxu0 }
 0x549   : > { %v4250_v30 = vpop.f32.mrb[15].mxu0 }
 0x54c   : > { %v5229_v32 = vpop.f32.mrb[16].mxu0 }
 0x54d   : > { %v4260_v18 = vpop.f32.mrb[17].mxu0 }
 0x558   : > { %1746 = vadd.xlane.f32.xlu1 %v1745_v31 }
 0x55c   : > { %1755 = vadd.xlane.f32.xlu1 %v1754_v26 }
 0x560   : > { %1093 = vadd.xlane.f32.xlu1 %v1092_v25  ;;  %1749 = vadd.xlane.f32.xlu0 %v1748_v28 }
 0x564   : > { %1099 = vadd.xlane.f32.xlu1 %v1098_v23  ;;  %1752 = vadd.xlane.f32.xlu0 %v1751_v24  ;;  %v737_v23 = vld [vmem:[%s5489_s7 + $0x10] sm:$0xff]  ;;  %v738_v24 = vld [vmem:[%s5489_s7 + $0x18] sm:$0xff] }
 0x568   : > { %1090 = vadd.xlane.f32.xlu0 %v1089_v10  ;;  %2597 = vmax.xlane.f32.xlu1 %v2596_v17 }
 0x56c   : > { %1096 = vadd.xlane.f32.xlu0 %v1095_v11 }
 0x570   : > { %2591 = vmax.xlane.f32.xlu0 %v2590_v43  ;;  %v4426_v43 = vpack.c.bf16 %v738_v24, %v737_v23 }
 0x579   : > { %2851 = vrot.lane.b32.xlu1 %v5004_v37, %s4729_s23 }
 0x57d   : > { %3468 = vrot.lane.b32.xlu1 %v4998_v35, %s4730_s24 }
 0x586   : > { %2699 = vrot.lane.b32.xlu0 %v4998_v35, %s4729_s23  ;;  %s4655_s23 = scalar_lea.vmem %s4654_s17, 1024 }
 0x587   : > { %p4657_p7 = scmp.lt.s32.totalorder %s4655_s23, %s4649_s21 }
 0x589   : > { %p4658_p8 = por %p4657_p7, %p4656_p4 }
 0x58a   : > { %3392 = vrot.lane.b32.xlu0 %v5002_v36, %s4730_s24 }
 0x58b   : > { %p4659_p11 = pnand %p4658_p8, %p4652_p3 }
 0x5a0   : > { %v2589_v54 = vpop.xlane.xlu1 %2588 }
 0x5a1   : > { %v2599_v55 = vsub.f32 %v5196_v4, %v2589_v54 }
 0x5a3   : > { %v2603_v56 = vmul.f32 1.442695, %v2599_v55 }
 0x5a4   : > { %v2776_v0 = vpop.permute.xlu1 %2775 }
 0x5a5   : > { %4545 = vpow2.f32 %v2603_v56 }
 0x5a8   : > { %v2595_v58 = vpop.xlane.xlu0 %2594  ;;  %v3039_v36 = vpop.permute.xlu1 %3038 }
 0x5a9   : > { %v2601_v60 = vsub.f32 %v5203_v13, %v2595_v58 }
 0x5ab   : > { %v2607_v62 = vmul.f32 1.442695, %v2601_v60 }
 0x5ac   : > { %v2624_v1 = vpop.permute.xlu0 %2623  ;;  %v3117_v5 = vpop.permute.xlu1 %3116 }
 0x5ad   : > { %4547 = vpow2.f32 %v2607_v62  ;;  %4315 = vmatpush3.msra.mxu1 %v2624_v1  ;;  %v744_v62 = vld [vmem:[%s5489_s7 + $0x48] sm:$0xff] }
 0x5ae   : > { %4324 = vmatprep.subr.mxu1 %v4726_v22 }
 0x5af   : > { %v4546_v2 = vpop.eup %4545 }
 0x5b0   : > { %4317 = vmatmul.mubr.msk.f32.vlgmr.msra.gmra.mrb[34].mxu1 %vm1064_vm5, %v4546_v2  ;;  %v2611_v35 = vsel %vm1064_vm5, %v4546_v2, 0.0  ;;  %v3037_v3 = vpop.permute.xlu0 %3036  ;;  %v3195_v7 = vpop.permute.xlu1 %3194  ;;  %v746_v2 = vld [vmem:[%s5489_s7 + $0x58] sm:$0xff] }
 0x5b1   : > { %4325 = vmatpush3.msra.mxu1 %v2776_v0  ;;  %2612 = vadd.xlane.f32.xlu1 %v2611_v35  ;;  %v745_v0 = vld [vmem:[%s5489_s7 + $0x50] sm:$0xff] }
 0x5b2   : > { %4326 = vmatprep.mubr.msk.f32.mxu1 %vm4727_vm1, %v4726_v22  ;;  %4348 = vmatprep.subr.mxu1 %v4726_v22  ;;  %v4434_v35 = vpack.c.bf16 %v746_v2, %v745_v0 }
 0x5b4   : > { %v3115_v6 = vpop.permute.xlu0 %3114  ;;  %v3273_v9 = vpop.permute.xlu1 %3272 }
 0x5b7   : > { %v5296_v4 = vpop.eup %4547 }
 0x5b8   : > { %4327 = vmatmul.mubr.msk.f32.vlgmr.msra.gmra.mrb[36].mxu1 %vm1064_vm5, %v5296_v4  ;;  %v3193_v8 = vpop.permute.xlu0 %3192 }
 0x5b9   : > { %4349 = vmatpush3.xpose.msk.msra.mxu1 %vm751_vm2, %v3039_v36  ;;  %4350 = vmatprep.mubr.msk.f32.mxu1 %vm4727_vm1, %v4726_v22 }
 0x5ba   : > { %4353 = vmatprep.subr.mxu1 %v4726_v22 }
 0x5bc   : > { %4351 = vmatmul.mubr.msk.f32.vlgmr.msra.gmra.mrb[38].mxu1 %vm751_vm2, %v3037_v3  ;;  %v3271_v12 = vpop.permute.xlu0 %3270 }
 0x5bd   : > { %4354 = vmatpush3.xpose.msk.msra.mxu1 %vm751_vm2, %v3117_v5  ;;  %4355 = vmatprep.mubr.msk.f32.mxu1 %vm4727_vm1, %v4726_v22 }
 0x5be   : > { %4358 = vmatprep.subr.mxu1 %v4726_v22 }
 0x5c0   : > { %4356 = vmatmul.mubr.msk.f32.vlgmr.msra.gmra.mrb[40].mxu1 %vm751_vm2, %v3115_v6 }
 0x5c1   : > { %4359 = vmatpush3.xpose.msk.msra.mxu1 %vm751_vm2, %v3195_v7  ;;  %4360 = vmatprep.mubr.msk.f32.mxu1 %vm4727_vm1, %v4726_v22 }
 0x5c2   : > { %4363 = vmatprep.subr.mxu1 %v4726_v22 }
 0x5c4   : > { %4361 = vmatmul.mubr.msk.f32.vlgmr.msra.gmra.mrb[42].mxu1 %vm751_vm2, %v3193_v8 }
 0x5c5   : > { %4364 = vmatpush3.xpose.msk.msra.mxu1 %vm751_vm2, %v3273_v9  ;;  %4365 = vmatprep.mubr.msk.f32.mxu1 %vm4727_vm1, %v4726_v22 }
 0x5c6   : > { %4373 = vmatprep.subr.mxu1 %v4726_v22 }
 0x5c8   : > { %4366 = vmatmul.mubr.msk.f32.vlgmr.msra.gmra.mrb[44].mxu1 %vm751_vm2, %v3271_v12 }
 0x5c9   : > { %4375 = vmatprep.mubr.msk.f32.mxu1 %vm4727_vm1, %v4726_v22 }
 0x5e5   : > { %v1747_v13 = vpop.xlane.xlu1 %1746 }
 0x5e6   : > { %4549 = vrcp.f32 %v1747_v13 }
 0x5e9   : > { %v1756_v14 = vpop.xlane.xlu1 %1755 }
 0x5ed   : > { %v1094_v15 = vpop.xlane.xlu1 %1093  ;;  %v1750_v16 = vpop.xlane.xlu0 %1749 }
 0x5ee   : > { %4551 = vrcp.f32 %v1750_v16 }
 0x5ef   : > { %4553 = vrcp.f32 %v1756_v14 }
 0x5f0   : > { %v4550_v30 = vpop.eup %4549 }
 0x5f1   : > { %v1100_v18 = vpop.xlane.xlu1 %1099  ;;  %v1753_v31 = vpop.xlane.xlu0 %1752  ;;  %v2066_v26 = vmul.f32 %v4550_v30, %v5227_v29 }
 0x5f2   : > { %4555 = vrcp.f32 %v1753_v31 }
 0x5f3   : > { %4274 = vmatprep.mubr.msk.f32.mxu0 %vm751_vm2, %v2066_v26  ;;  %4557 = vrcp.f32 %v1094_v15 }
 0x5f5   : > { %v1091_v25 = vpop.xlane.xlu0 %1090  ;;  %v2598_v28 = vpop.xlane.xlu1 %2597 }
 0x5f6   : > { %4559 = vrcp.f32 %v1091_v25  ;;  %v2602_v27 = vsub.f32 %v5244_v21, %v2598_v28 }
 0x5f7   : > { %4561 = vrcp.f32 %v1100_v18 }
 0x5f8   : > { %v2609_v10 = vmul.f32 1.442695, %v2602_v27  ;;  %v4552_v29 = vpop.eup %4551 }
 0x5f9   : > { %v1097_v17 = vpop.xlane.xlu0 %1096  ;;  %v2852_v33 = vpop.permute.xlu1 %2851  ;;  %v2068_v11 = vmul.f32 %v4552_v29, %v5189_v61 }
 0x5fa   : > { %4563 = vpow2.f32 %v2609_v10  ;;  %v4554_v19 = vpop.eup %4553 }
 0x5fb   : > { %4565 = vrcp.f32 %v1097_v17  ;;  %4275 = vmatmul.mubr.msk.f32.vlgmr.msra.gmra.mrb[18].mxu0 %vm751_vm2, %v2068_v11  ;;  %v2072_v61 = vmul.f32 %v4554_v19, %v5191_v63 }
 0x5fc   : > { %v4556_v21 = vpop.eup %4555  ;;  %4425 = vmatpush3.bf16.msra.mxu0 %v5279_v53 }
 0x5fd   : > { %v2592_v45 = vpop.xlane.xlu0 %2591  ;;  %v3469_v46 = vpop.permute.xlu1 %3468  ;;  %v2070_v47 = vmul.f32 %v4556_v21, %v5229_v32  ;;  %4427 = vmatprep.subr.bf16.mxu0 %v4426_v43 }
 0x5fe   : > { %v2600_v20 = vsub.f32 %v5255_v41, %v2592_v45  ;;  %4374 = vmatpush3.msra.mxu1 %v3469_v46  ;;  %v4558_v50 = vpop.eup %4557 }
 0x5ff   : > { %4383 = vmatprep.subr.mxu1 %v4726_v22  ;;  %4277 = vmatprep.mubr.msk.f32.mxu0 %vm751_vm2, %v2070_v47  ;;  %v1396_v54 = vmul.f32 %v4558_v50, %v5102_v34 }
 0x600   : > { %v4560_v51 = vpop.eup %4559  ;;  %v2605_v52 = vmul.f32 1.442695, %v2600_v20  ;;  %4278 = vmatmul.mubr.msk.f32.gmra.mrb[20].mxu0 %vm751_vm2, %v2072_v61 }
 0x601   : > { %v1394_v53 = vmul.f32 %v4560_v51, %v5132_v57  ;;  %4429 = vmatpush3.bf16.msra.mxu0 %v4426_v43  ;;  %v4562_v41 = vpop.eup %4561  ;;  %v2700_v55 = vpop.permute.xlu0 %2699 }
 0x602   : > { %4567 = vpow2.f32 %v2605_v52  ;;  %4319 = vmatprep.subr.mxu0 %v4726_v22  ;;  %v1400_v58 = vmul.f32 %v4562_v41, %v5104_v42  ;;  %v2617_v42 = vsel %vm1064_vm5, %v5296_v4, 0.0 }
 0x603   : > { %4288 = vmatprep.mubr.msk.f32.mxu0 %vm751_vm2, %v1394_v53 }
 0x604   : > { %v4564_v63 = vpop.eup %4563  ;;  %4289 = vmatmul.mubr.msk.f32.vlgmr.msra.gmra.mrb[18].mxu0 %vm751_vm2, %v1396_v54 }
 0x605   : > { %v4566_v32 = vpop.eup %4565  ;;  %v2620_v56 = vsel %vm1064_vm5, %v4564_v63, 0.0  ;;  %4320 = vmatpush3.msra.mxu0 %v2700_v55  ;;  %v3393_v49 = vpop.permute.xlu0 %3392 }
 0x606   : > { %2621 = vadd.xlane.f32.xlu1 %v2620_v56  ;;  %v1398_v57 = vmul.f32 %v4566_v32, %v5136_v59  ;;  %4329 = vmatprep.subr.mxu0 %v4726_v22  ;;  %v743_v59 = vld [vmem:[%s5489_s7 + $0x40] sm:$0xff] }
 0x607   : > { %v4430_v1 = vpack.c.bf16 %v744_v62, %v743_v59 }
 0x608   : > { %4291 = vmatprep.mubr.msk.f32.mxu0 %vm751_vm2, %v1398_v57 }
 0x609   : > { %4292 = vmatmul.mubr.msk.f32.gmra.mrb[20].mxu0 %vm751_vm2, %v1400_v58 }
 0x60a   : > { %4321 = vmatprep.mubr.msk.f32.mxu0 %vm4727_vm1, %v4726_v22 }
 0x60c   : > { %v4568_v34 = vpop.eup %4567 }
 0x60d   : > { %4322 = vmatmul.mubr.msk.f32.vlgmr.msra.gmra.mrb[22].mxu0 %vm1064_vm5, %v4568_v34  ;;  %v2614_v60 = vsel %vm1064_vm5, %v4568_v34, 0.0 }
 0x60e   : > { %4330 = vmatpush3.msra.mxu0 %v2852_v33  ;;  %2615 = vadd.xlane.f32.xlu0 %v2614_v60 }
 0x60f   : > { %4331 = vmatprep.mubr.msk.f32.mxu0 %vm4727_vm1, %v4726_v22  ;;  %4431 = vmatprep.subr.bf16.mxu0 %v4430_v1 }
 0x611   : > { %4332 = vmatmul.mubr.msk.f32.vlgmr.msra.gmra.mrb[24].mxu0 %vm1064_vm5, %v4564_v63 }
 0x612   : > { %2618 = vadd.xlane.f32.xlu0 %v2617_v42  ;;  %4433 = vmatpush3.bf16.msra.mxu0 %v4430_v1 }
 0x613   : > { %4435 = vmatprep.subr.bf16.mxu0 %v4434_v35 }
 0x616   : > { %4437 = vmatpush3.bf16.msra.mxu0 %v4434_v35 }
 0x617   : > { %4368 = vmatprep.subr.mxu0 %v4726_v22 }
 0x63e   : > { %v2613_v36 = vpop.xlane.xlu1 %2612 }
 0x63f   : > { %4569 = vrcp.f32 %v2613_v36  ;;  %v747_v36 = vld [vmem:[%s5489_s7 + $0x60] sm:$0xff] }
 0x649   : > { %v4570_v3 = vpop.eup %4569 }
 0x683   : > { %v2695_v4 = vpop.f32.mrb[34].mxu1 }
 0x684   : > { %v2928_v5 = vmul.f32 %v4570_v3, %v2695_v4  ;;  %v4318_v6 = vpop.f32.mrb[35].mxu1  ;;  %v749_v4 = vld [vmem:[%s5489_s7 + $0x70] sm:$0xff] }
 0x686   : > { %4342 = vmatprep.mubr.msk.f32.mxu0 %vm751_vm2, %v2928_v5  ;;  %v750_v5 = vld [vmem:[%s5489_s7 + $0x78] sm:$0xff] }
 0x687   : > { %v4442_v6 = vpack.c.bf16 %v750_v5, %v749_v4 }
 0x68b   : > { %v2847_v7 = vpop.f32.mrb[36].mxu1 }
 0x68c   : > { %v4328_v8 = vpop.f32.mrb[37].mxu1 }
 0x68f   : > { %v3110_v9 = vpop.f32.mrb[38].mxu1 }
 0x690   : > { %v3348_v12 = vmul.f32 0.17677669, %v3110_v9  ;;  %v4352_v13 = vpop.f32.mrb[39].mxu1 }
 0x692   : > { %v3352_v14 = vsel %vm731_vm7, %v3348_v12, -1000000.0 }
 0x693   : > { %v3188_v15 = vpop.f32.mrb[40].mxu1  ;;  %v3356_v16 = vsel %vm1064_vm5, %v3352_v14, -inf  ;;  %v2622_v43 = vpop.xlane.xlu1 %2621 }
 0x694   : > { %v3349_v30 = vmul.f32 0.17677669, %v3188_v15  ;;  %3357 = vmax.xlane.f32.xlu0 %v3356_v16  ;;  %v4357_v18 = vpop.f32.mrb[41].mxu1 }
 0x696   : > { %v3353_v31 = vsel %vm732_vm3, %v3349_v30, -1000000.0 }
 0x697   : > { %v3266_v26 = vpop.f32.mrb[42].mxu1  ;;  %v3359_v25 = vsel %vm1064_vm5, %v3353_v31, -inf }
 0x698   : > { %v3350_v28 = vmul.f32 0.17677669, %v3266_v26  ;;  %3360 = vmax.xlane.f32.xlu1 %v3359_v25  ;;  %v4362_v27 = vpop.f32.mrb[43].mxu1 }
 0x69a   : > { %v3354_v44 = vsel %vm733_vm4, %v3350_v28, -1000000.0 }
 0x69b   : > { %v3344_v23 = vpop.f32.mrb[44].mxu1  ;;  %v3362_v24 = vsel %vm1064_vm5, %v3354_v44, -inf  ;;  %v2616_v33 = vpop.xlane.xlu0 %2615 }
 0x69c   : > { %v3351_v10 = vmul.f32 0.17677669, %v3344_v23  ;;  %3363 = vmax.xlane.f32.xlu0 %v3362_v24  ;;  %v4367_v29 = vpop.f32.mrb[45].mxu1 }
 0x69e   : > { %v3355_v39 = vsel %vm734_vm6, %v3351_v10, -1000000.0 }
 0x69f   : > { %v3365_v17 = vsel %vm1064_vm5, %v3355_v39, -inf  ;;  %v2619_v11 = vpop.xlane.xlu0 %2618 }
 0x6a0   : > { %3366 = vmax.xlane.f32.xlu1 %v3365_v17  ;;  %4571 = vrcp.f32 %v2619_v11 }
 0x6a1   : > { %4573 = vrcp.f32 %v2616_v33 }
 0x6a2   : > { %4575 = vrcp.f32 %v2622_v43 }
 0x6aa   : > { %v4572_v19 = vpop.eup %4571 }
 0x6ab   : > { %v4574_v21 = vpop.eup %4573  ;;  %v2932_v46 = vmul.f32 %v4572_v19, %v2847_v7 }
 0x6ac   : > { %v4576_v20 = vpop.eup %4575 }
 0x6b1   : > { %3544 = vrot.lane.b32.xlu1 %v5007_v38, %s4730_s24 }
 0x6b2   : > { %3620 = vrot.lane.b32.xlu0 %v5004_v37, %s4730_s24  ;;  %s5437_s24 = scalar_lea.hbm %s5490_s8, %s4041_s29 }
 0x6e0   : > { %v2771_v40 = vpop.f32.mrb[22].mxu0 }
 0x6e1   : > { %v2930_v48 = vmul.f32 %v4574_v21, %v2771_v40  ;;  %v4323_v45 = vpop.f32.mrb[23].mxu0 }
 0x6e3   : > { %4343 = vmatmul.mubr.msk.f32.vlgmr.msra.gmra.mrb[18].mxu0 %vm751_vm2, %v2930_v48 }
 0x6e4   : > { %4369 = vmatpush3.msra.mxu0 %v3393_v49  ;;  %v2923_v38 = vpop.f32.mrb[24].mxu0  ;;  %4345 = vmatprep.mubr.msk.f32.mxu0 %vm751_vm2, %v2932_v46 }
 0x6e5   : > { %v2934_v37 = vmul.f32 %v4576_v20, %v2923_v38  ;;  %v4333_v47 = vpop.f32.mrb[25].mxu0  ;;  %4378 = vmatprep.subr.mxu0 %v4726_v22 }
 0x6e7   : > { %4346 = vmatmul.mubr.msk.f32.gmra.mrb[20].mxu0 %vm751_vm2, %v2934_v37 }
 0x6e8   : > { %4370 = vmatprep.mubr.msk.f32.mxu0 %vm4727_vm1, %v4726_v22 }
 0x721   : > { %v3358_v50 = vpop.xlane.xlu0 %3357 }
 0x722   : > { %v3368_v61 = vsub.f32 %v3352_v14, %v3358_v50 }
 0x724   : > { %v3372_v51 = vmul.f32 1.442695, %v3368_v61 }
 0x725   : > { %v3361_v52 = vpop.xlane.xlu1 %3360 }
 0x726   : > { %4577 = vpow2.f32 %v3372_v51  ;;  %v3369_v53 = vsub.f32 %v3353_v31, %v3361_v52 }
 0x728   : > { %v3374_v41 = vmul.f32 1.442695, %v3369_v53 }
 0x729   : > { %v3364_v54 = vpop.xlane.xlu0 %3363 }
 0x72a   : > { %4579 = vpow2.f32 %v3374_v41  ;;  %v3370_v63 = vsub.f32 %v3354_v44, %v3364_v54 }
 0x72c   : > { %v3376_v32 = vmul.f32 1.442695, %v3370_v63 }
 0x72d   : > { %v3367_v55 = vpop.xlane.xlu1 %3366  ;;  %v3621_v59 = vpop.permute.xlu0 %3620 }
 0x72e   : > { %4581 = vpow2.f32 %v3376_v32  ;;  %v3371_v56 = vsub.f32 %v3355_v39, %v3367_v55 }
 0x730   : > { %v4578_v57 = vpop.eup %4577  ;;  %v3378_v58 = vmul.f32 1.442695, %v3371_v56 }
 0x731   : > { %4371 = vmatmul.mubr.msk.f32.vlgmr.msra.gmra.mrb[26].mxu0 %vm1064_vm5, %v4578_v57  ;;  %v3545_v34 = vpop.permute.xlu1 %3544  ;;  %v3380_v60 = vsel %vm1064_vm5, %v4578_v57, 0.0 }
 0x732   : > { %4583 = vpow2.f32 %v3378_v58  ;;  %3381 = vadd.xlane.f32.xlu1 %v3380_v60  ;;  %4379 = vmatpush3.msra.mxu0 %v3545_v34 }
 0x733   : > { %4380 = vmatprep.mubr.msk.f32.mxu0 %vm4727_vm1, %v4726_v22 }
 0x734   : > { %v4580_v42 = vpop.eup %4579 }
 0x735   : > { %4376 = vmatmul.mubr.msk.f32.vlgmr.msra.gmra.mrb[46].mxu1 %vm1064_vm5, %v4580_v42  ;;  %v3383_v62 = vsel %vm1064_vm5, %v4580_v42, 0.0 }
 0x736   : > { %4384 = vmatpush3.msra.mxu1 %v3621_v59  ;;  %3384 = vadd.xlane.f32.xlu0 %v3383_v62 }
 0x737   : > { %4385 = vmatprep.mubr.msk.f32.mxu1 %vm4727_vm1, %v4726_v22  ;;  %v748_v22 = vld [vmem:[%s5489_s7 + $0x68] sm:$0xff] }
 0x738   : > { %v4582_v0 = vpop.eup %4581  ;;  %v4438_v3 = vpack.c.bf16 %v748_v22, %v747_v36 }
 0x739   : > { %4381 = vmatmul.mubr.msk.f32.vlgmr.msra.gmra.mrb[28].mxu0 %vm1064_vm5, %v4582_v0  ;;  %v3386_v1 = vsel %vm1064_vm5, %v4582_v0, 0.0 }
 0x73a   : > { %3387 = vadd.xlane.f32.xlu0 %v3386_v1  ;;  %4439 = vmatprep.subr.bf16.mxu0 %v4438_v3 }
 0x73b   : > { %4441 = vmatpush3.bf16.msra.mxu0 %v4438_v3 }
 0x73c   : > { %v4584_v2 = vpop.eup %4583  ;;  %4443 = vmatprep.subr.bf16.mxu0 %v4442_v6 }
 0x73d   : > { %4386 = vmatmul.mubr.msk.f32.vlgmr.msra.gmra.mrb[48].mxu1 %vm1064_vm5, %v4584_v2  ;;  %v3389_v35 = vsel %vm1064_vm5, %v4584_v2, 0.0 }
 0x73e   : > { %3390 = vadd.xlane.f32.xlu1 %v3389_v35 }
 0x73f   : > { %4445 = vmatpush3.bf16.msra.mxu0 %v4442_v6 }
 0x7bf   : > { %v3382_v7 = vpop.xlane.xlu1 %3381 }
 0x7c0   : > { %4585 = vrcp.f32 %v3382_v7 }
 0x7c3   : > { %v3385_v8 = vpop.xlane.xlu0 %3384 }
 0x7c4   : > { %4587 = vrcp.f32 %v3385_v8 }
 0x7c7   : > { %v3388_v9 = vpop.xlane.xlu0 %3387 }
 0x7c8   : > { %4589 = vrcp.f32 %v3388_v9 }
 0x7ca   : > { %v4586_v13 = vpop.eup %4585 }
 0x7cb   : > { %v3391_v12 = vpop.xlane.xlu1 %3390 }
 0x7cc   : > { %4591 = vrcp.f32 %v3391_v12 }
 0x7ce   : > { %v4588_v30 = vpop.eup %4587 }
 0x7d2   : > { %v4590_v25 = vpop.eup %4589 }
 0x7d6   : > { %v4592_v23 = vpop.eup %4591 }
 0x804   : > { %v3464_v14 = vpop.f32.mrb[26].mxu0 }
 0x805   : > { %v3697_v15 = vmul.f32 %v4586_v13, %v3464_v14  ;;  %v4372_v16 = vpop.f32.mrb[27].mxu0 }
 0x807   : > { %4396 = vmatprep.mubr.msk.f32.mxu0 %vm751_vm2, %v3697_v15 }
 0x808   : > { %v3540_v18 = vpop.f32.mrb[46].mxu1 }
 0x809   : > { %v3699_v31 = vmul.f32 %v4588_v30, %v3540_v18  ;;  %v4377_v26 = vpop.f32.mrb[47].mxu1 }
 0x80b   : > { %4397 = vmatmul.mubr.msk.f32.vlgmr.msra.gmra.mrb[18].mxu0 %vm751_vm2, %v3699_v31 }
 0x80c   : > { %v3616_v28 = vpop.f32.mrb[28].mxu0 }
 0x80d   : > { %v3701_v27 = vmul.f32 %v4590_v25, %v3616_v28  ;;  %v4382_v44 = vpop.f32.mrb[29].mxu0 }
 0x80f   : > { %4399 = vmatprep.mubr.msk.f32.mxu0 %vm751_vm2, %v3701_v27 }
 0x810   : > { %v3692_v24 = vpop.f32.mrb[48].mxu1 }
 0x811   : > { %v3703_v10 = vmul.f32 %v4592_v23, %v3692_v24  ;;  %v4387_v29 = vpop.f32.mrb[49].mxu1 }
 0x813   : > { %4400 = vmatmul.mubr.msk.f32.gmra.mrb[20].mxu0 %vm751_vm2, %v3703_v10 }
 0x8de   : > { %v4398_v39 = vpop.f32.mrb[18].mxu0 }
 0x8df   : > { %3806 = vst.msk [vmem:[%s377_s18 + $0x8] sm:$0xff] %vm751_vm2, %v4398_v39  ;;  %v3782_v17 = vpop.f32.mrb[19].mxu0 }
 0x8e0   : > { %3805 = vst.msk [vmem:[%s377_s18] sm:$0xff] %vm751_vm2, %v3782_v17 }
 0x8e6   : > { %v4401_v49 = vpop.f32.mrb[20].mxu0 }
 0x8e7   : > { %3808 = vst.msk [vmem:[%s377_s18 + $0x18] sm:$0xff] %vm751_vm2, %v4401_v49  ;;  %v3792_v33 = vpop.f32.mrb[21].mxu0 }
 0x8e8   : > { %3807 = vst.msk [vmem:[%s377_s18 + $0x10] sm:$0xff] %vm751_vm2, %v3792_v33 }
 0x8e9   : > { %4662 = shalt.err (!%p4659_p11)
}
 0x8ea   : > { %s4663_s25 = scalar_lea.hbm %s5437_s24, 512  ;;  %s4667_s12 = scalar_lea.hbm %s5490_s8, 1024 }
 0x8eb   : > { %p4664_p13 = scmp.ne.s32.totalorder %s5437_s24, %s4663_s25  ;;  %p4668_p6 = scmp.lt.u32.totalorder %s5437_s24, %s5490_s8 }
 0x8ec   : > { %p4669_p9 = scmp.lt.u32.totalorder %s4667_s12, %s4663_s25  ;;  %p4671_p12 = scmp.lt.u32.totalorder %s4663_s25, %s5437_s24 }
 0x8ed   : > { %p4665_p5 = pnand %p4664_p13, %p5506_p1 }
 0x8ee   : > { %p4670_p10 = por %p4669_p9, %p4668_p6 }
 0x8ef   : > { %p4666_p0 = pneg %p4665_p5 }
 0x8f0   : > { %p4672_p2 = por %p4671_p12, %p4670_p10 }
 0x8f2   : > { %p4673_p3 = pnand %p4672_p2, %p4666_p0 }
 0x8f4   : > { %4676 = shalt.err (!%p4673_p3)
}
 0x8f5   : > { %s4732_s29 = smov 128   ;;  %s4733_s14 = smov 8  }
 0x8f6   : > { %4466 = dma.vmem_to_hbm [thread:$0]  (%p5506_p1), %s5432_s19, 512, %s5437_s24, %s5441_s22, %s4732_s29, %s4732_s29, %s4733_s14  }
 0x8f7 PF: > { %p4483_p4 = scmp.ge.s32.totalorder %s4719_s30, 2  ;;  %s3838_s20 = sand.u32 1, %s4707_s27  }
 0x8f8   : > { %p5507_p7 = scmp.ne.s32.totalorder %s5498_s16, 0  ;;  %s3839_s21 = scalar_lea.sflag [#allocation4], %s3838_s20 }
 0x8fa   : > { %p4476_p8 = pnand %p4483_p4, %p5507_p7 }
 0x8fc   : > { %4702 = dma.done.wait (!%p4476_p8), %s3839_s21, 512  }
 0x8fd   : > { %4704 = vsyncadd (!%p4476_p8), %s3839_s21, 4294966784  ;;  %s5508_s9 = sld [smem:[#allocation11_spill]]  ;;  %s5509_s29 = sld [smem:[#allocation12_spill]] }
 0x8fe   : > { %p20_p11 = scmp.ge.s32.totalorder %s4804_s11, 4   ;;  %s5510_s27 = smov %s4711_s28 }
 0x8ff   : > { %s5512_s30 = smov %s4804_s11 }
 0x900   :  { %22 = sbr.rel (!%p20_p11) target bundleno = 5 (0x5), region = 105 }
 0x903   : > { %s5511_s28 = smov %s5508_s9 }
 0x907   :  { %3844 = vsyncpa [#allocation3], 1 }
 0x908   :  { %3846 = vsyncpa [#allocation3 + $0x1], 1 }
 0x909   :  { %3847 = vsyncpa [#allocation6], 1 }
 0x90a   :  { %3848 = vsyncpa [#allocation4], 1 }
 0x90b   :  { %3850 = vsyncpa [#allocation4 + $0x1], 1 }

</bundles_post_ra>
